<compile_context>
chip_gen: v5e
topology: v5e:2x2
jax: 0.10.0
libtpu: 0.0.40
codegen_flags: <defaults>
</compile_context>

<pallas_src>
import functools

import jax
import jax.numpy as jnp
from jax.experimental import pallas as pl
from jax.experimental.pallas import tpu as pltpu


# ------------------------------ fused kernel -------------------------------

def _salclass_kernel(
    # batch-tile input (token slab, already embedded / cls / pos / padded)
    tok_ref,
    # per-layer inputs (depth-stacked; BlockSpec streams layer pl.program_id(1))
    ln1g_ref, ln1b_ref, wqkv_ref, wo_ref, bo_ref,
    ln2g_ref, ln2b_ref, w1_ref, b1_ref, w2_ref, b2_ref,
    # classification head (constant)
    hlng_ref, hlnb_ref, hw_ref, hb_ref,
    # output
    o_ref,
    # scratch: residual stream (bt*S_pad, dim), VMEM-resident across layers
    x_sc,
    *, bt, s_pad, s_valid, heads, dim_head, scale):
  l = pl.program_id(1)
  inner = heads * dim_head
  f32 = jnp.float32
  bf16 = jnp.bfloat16

  def layer_norm(z, g, b):
    mu = jnp.mean(z, axis=-1, keepdims=True)
    var = jnp.mean(jnp.square(z - mu), axis=-1, keepdims=True)
    return (z - mu) * jax.lax.rsqrt(var + 1e-5) * g + b      # torch LN eps

  # ---- layer 0 of this batch tile: load the embedded tokens (dense copy) ----
  @pl.when(l == 0)
  def _():
    x_sc[...] = tok_ref[...]

  x = x_sc[...]                                              # (bt*s_pad, dim) f32
  dim = x.shape[-1]

  # ---- PreNorm multi-head self-attention + residual ----
  h1 = layer_norm(x, ln1g_ref[...], ln1b_ref[...])
  # to_qkv has no bias in the reference ViT.
  qkv = jnp.dot(h1.astype(bf16), wqkv_ref[...],
                preferred_element_type=f32)                  # (bt*s_pad, 3*inner)
  qkv = qkv.reshape(bt, s_pad, 3 * inner)

  if s_pad > s_valid:
    kidx = jax.lax.broadcasted_iota(jnp.int32, (1, 1, s_pad), 2)
    kvalid = kidx < s_valid                                  # mask padded keys
  else:
    kvalid = None

  head_outs = []
  for hd in range(heads):                                    # short, unrolled
    lo = hd * dim_head
    qh = qkv[:, :, lo:lo + dim_head].astype(bf16)
    kh = qkv[:, :, inner + lo:inner + lo + dim_head].astype(bf16)
    vh = qkv[:, :, 2 * inner + lo:2 * inner + lo + dim_head].astype(bf16)
    sc = jnp.einsum('bqd,bkd->bqk', qh, kh,
                    preferred_element_type=f32) * scale      # (bt, s_pad, s_pad)
    if kvalid is not None:
      sc = jnp.where(kvalid, sc, -jnp.inf)
    sc = sc - jnp.max(sc, axis=-1, keepdims=True)
    p = jnp.exp(sc)
    p = p * pl.reciprocal(jnp.sum(p, axis=-1, keepdims=True), approx=True)
    head_outs.append(jnp.einsum('bqk,bkd->bqd', p.astype(bf16), vh,
                                preferred_element_type=f32))
  # fuse heads -> one MXU pass with K = inner against the full wo
  attn = jnp.concatenate(head_outs, axis=-1).reshape(bt * s_pad, inner)
  attn = jnp.dot(attn.astype(bf16), wo_ref[...],
                 preferred_element_type=f32) + bo_ref[...]
  x = x + attn

  # ---- PreNorm MLP (Linear -> GELU -> Linear) + residual ----
  h2 = layer_norm(x, ln2g_ref[...], ln2b_ref[...])
  h2 = jnp.dot(h2.astype(bf16), w1_ref[...],
               preferred_element_type=f32) + b1_ref[...]
  # TODO(synk): PyTorch nn.GELU() is the exact erf form; tanh-approx GELU used
  # here for guaranteed Mosaic lowering (max abs diff ~1e-3).
  h2 = jax.nn.gelu(h2, approximate=True)
  x = x + jnp.dot(h2.astype(bf16), w2_ref[...],
                  preferred_element_type=f32) + b2_ref[...]

  x_sc[...] = x                                              # carry to next layer

  # ---- last layer: cls pooling -> LayerNorm -> Linear(num_classes) ----
  @pl.when(l == pl.num_programs(1) - 1)
  def _():
    cls_tok = x.reshape(bt, s_pad, dim)[:, 0, :]             # (bt, dim)
    cls_tok = layer_norm(cls_tok, hlng_ref[...], hlnb_ref[...])
    o_ref[...] = (jnp.dot(cls_tok.astype(bf16), hw_ref[...],
                          preferred_element_type=f32) + hb_ref[...])
    # NOTE: SalClass.forward never applies self.final (Softmax) -> logits.


# --------------------------- parameters / forward ---------------------------

def init_params(key, *, img_size, patch, channels, dim, depth, heads, dim_head,
                mlp_dim, num_classes):
  n_patches = (img_size // patch) ** 2
  patch_dim = channels * patch * patch
  inner = heads * dim_head
  ks = jax.random.split(key, 8)

  def nrm(k, shape, s=0.02):
    return s * jax.random.normal(k, shape, jnp.float32)

  bf16 = jnp.bfloat16
  return dict(
      patch_w=nrm(ks[0], (patch_dim, dim)),                 # used in XLA wrapper
      patch_b=jnp.zeros((dim,), jnp.float32),
      cls=nrm(ks[1], (1, dim)),
      pos=nrm(ks[2], (n_patches + 1, dim)),
      head_ln_g=jnp.ones((1, dim), jnp.float32),
      head_ln_b=jnp.zeros((1, dim), jnp.float32),
      head_w=nrm(ks[3], (dim, num_classes)).astype(bf16),   # matmul weights bf16
      head_b=jnp.zeros((1, num_classes), jnp.float32),
      # per-layer weights, stacked along depth
      ln1_g=jnp.ones((depth, 1, dim), jnp.float32),
      ln1_b=jnp.zeros((depth, 1, dim), jnp.float32),
      wqkv=nrm(ks[4], (depth, dim, 3 * inner)).astype(bf16),  # to_qkv (no bias)
      wo=nrm(ks[5], (depth, inner, dim)).astype(bf16),
      bo=jnp.zeros((depth, 1, dim), jnp.float32),
      ln2_g=jnp.ones((depth, 1, dim), jnp.float32),
      ln2_b=jnp.zeros((depth, 1, dim), jnp.float32),
      w1=nrm(ks[6], (depth, dim, mlp_dim)).astype(bf16),
      b1=jnp.zeros((depth, 1, mlp_dim), jnp.float32),
      w2=nrm(ks[7], (depth, mlp_dim, dim)).astype(bf16),
      b2=jnp.zeros((depth, 1, dim), jnp.float32),
  )


def _round_up(x, m):
  return (x + m - 1) // m * m


def salclass_forward(params, x1, x2, *, patch, heads, dim_head, batch_tile=1):
  # brutefusion_backbone: brute early fusion = channel concat (3 + 1 -> 4 ch).
  x = jnp.concatenate([x1, x2], axis=1)                     # (B, 4, H, W)
  B, C, H, W = x.shape
  dim = params['patch_w'].shape[1]
  num_classes = params['head_w'].shape[1]
  mlp_dim = params['w1'].shape[-1]
  depth = params['wqkv'].shape[0]
  inner = heads * dim_head
  patch_dim = C * patch * patch

  hh, ww = H // patch, W // patch
  N = hh * ww
  S = N + 1
  S_pad = _round_up(S, 8)                                   # sublane-aligned seq
  C_pad = _round_up(num_classes, 128)                       # lane-aligned classes

  # Patchify + patch embedding (+cls +pos +pad) in XLA: one-time data movement
  # and a single small matmul; keeps xp / patch_w out of the kernel's VMEM.
  xp = (x.reshape(B, C, hh, patch, ww, patch)
         .transpose(0, 2, 4, 3, 5, 1)
         .reshape(B, N, patch_dim))
  tok = jnp.dot(xp, params['patch_w']) + params['patch_b']  # (B, N, dim)
  cls = jnp.broadcast_to(params['cls'][None], (B, 1, dim))
  tok = jnp.concatenate([cls, tok], axis=1) + params['pos'][None, :S, :]
  tok = jnp.pad(tok, ((0, 0), (0, S_pad - S), (0, 0))).astype(jnp.float32)

  assert B % batch_tile == 0
  bb = B // batch_tile
  tok = tok.reshape(bb, batch_tile * S_pad, dim)

  head_w = jnp.pad(params['head_w'], ((0, 0), (0, C_pad - num_classes)))
  head_b = jnp.pad(params['head_b'], ((0, 0), (0, C_pad - num_classes)))

  scale = float(dim_head) ** -0.5
  kern = functools.partial(_salclass_kernel, bt=batch_tile, s_pad=S_pad,
                           s_valid=S, heads=heads, dim_head=dim_head,
                           scale=scale)

  const2 = lambda b, l: (0, 0)
  layer3 = lambda b, l: (l, 0, 0)
  batch3 = lambda b, l: (b, 0, 0)

  out = pl.pallas_call(
      kern,
      out_shape=jax.ShapeDtypeStruct((bb, batch_tile, C_pad), jnp.float32),
      grid=(bb, depth),
      in_specs=[
          pl.BlockSpec((None, batch_tile * S_pad, dim), batch3),  # tok slab
          pl.BlockSpec((None, 1, dim), layer3),            # ln1_g
          pl.BlockSpec((None, 1, dim), layer3),            # ln1_b
          pl.BlockSpec((None, dim, 3 * inner), layer3),    # wqkv (bf16)
          pl.BlockSpec((None, inner, dim), layer3),        # wo   (bf16)
          pl.BlockSpec((None, 1, dim), layer3),            # bo
          pl.BlockSpec((None, 1, dim), layer3),            # ln2_g
          pl.BlockSpec((None, 1, dim), layer3),            # ln2_b
          pl.BlockSpec((None, dim, mlp_dim), layer3),      # w1   (bf16)
          pl.BlockSpec((None, 1, mlp_dim), layer3),        # b1
          pl.BlockSpec((None, mlp_dim, dim), layer3),      # w2   (bf16)
          pl.BlockSpec((None, 1, dim), layer3),            # b2
          pl.BlockSpec((1, dim), const2),                  # head_ln_g
          pl.BlockSpec((1, dim), const2),                  # head_ln_b
          pl.BlockSpec((dim, C_pad), const2),              # head_w (padded, bf16)
          pl.BlockSpec((1, C_pad), const2),                # head_b (padded)
      ],
      out_specs=pl.BlockSpec((None, batch_tile, C_pad), batch3),
      scratch_shapes=[pltpu.VMEM((batch_tile * S_pad, dim), jnp.float32)],
      compiler_params=pltpu.CompilerParams(
          # batch tiles -> megacore on v7x; depth is the sequential weight-stream
          # axis.  (For large real-ViT dims, also set vmem_limit_bytes here.)
          dimension_semantics=("parallel", "arbitrary")),
  )(tok,
    params['ln1_g'], params['ln1_b'], params['wqkv'], params['wo'],
    params['bo'], params['ln2_g'], params['ln2_b'], params['w1'],
    params['b1'], params['w2'], params['b2'],
    params['head_ln_g'], params['head_ln_b'], head_w, head_b)

  logits = out.reshape(B, C_pad)[:, :num_classes]
  # NOTE: self.final (Softmax) is never applied in SalClass.forward -> logits.
  return logits


# ----------------------------------- main -----------------------------------

if __name__ == "__main__":
  # small, module-consistent shapes (lane/sublane-friendly where we can choose)
  B, IMG, PATCH = 2, 16, 8
  DIM, DEPTH, HEADS, DIM_HEAD, MLP_DIM, NUM_CLASSES = 128, 2, 2, 64, 256, 16

  key = jax.random.PRNGKey(0)
  k1, k2, kp = jax.random.split(key, 3)
  x1 = jax.random.normal(k1, (B, 3, IMG, IMG), jnp.float32)   # RGB image (NCHW)
  x2 = jax.random.normal(k2, (B, 1, IMG, IMG), jnp.float32)   # saliency/depth map

  params = init_params(kp, img_size=IMG, patch=PATCH, channels=4, dim=DIM,
                       depth=DEPTH, heads=HEADS, dim_head=DIM_HEAD,
                       mlp_dim=MLP_DIM, num_classes=NUM_CLASSES)

  fwd = jax.jit(functools.partial(salclass_forward, patch=PATCH, heads=HEADS,
                                  dim_head=DIM_HEAD, batch_tile=1))
  out = fwd(params, x1, x2)
  jax.block_until_ready(out)
  assert out.shape == (B, NUM_CLASSES), out.shape
  assert bool(jnp.all(jnp.isfinite(out)))
  print("KERNEL_OK")
</pallas_src>

<mosaic_0001>
module attributes {stable_mosaic.version = 11 : i64} {
  func.func @_salclass_kernel(%arg0: i32, %arg1: i32, %arg2: memref<1x8x128xf32, #tpu.memory_space<vmem>>, %arg3: memref<1x1x128xf32, #tpu.memory_space<vmem>>, %arg4: memref<1x1x128xf32, #tpu.memory_space<vmem>>, %arg5: memref<1x128x384xbf16, #tpu.memory_space<vmem>>, %arg6: memref<1x128x128xbf16, #tpu.memory_space<vmem>>, %arg7: memref<1x1x128xf32, #tpu.memory_space<vmem>>, %arg8: memref<1x1x128xf32, #tpu.memory_space<vmem>>, %arg9: memref<1x1x128xf32, #tpu.memory_space<vmem>>, %arg10: memref<1x128x256xbf16, #tpu.memory_space<vmem>>, %arg11: memref<1x1x256xf32, #tpu.memory_space<vmem>>, %arg12: memref<1x256x128xbf16, #tpu.memory_space<vmem>>, %arg13: memref<1x1x128xf32, #tpu.memory_space<vmem>>, %arg14: memref<1x128xf32, #tpu.memory_space<vmem>>, %arg15: memref<1x128xf32, #tpu.memory_space<vmem>>, %arg16: memref<128x128xbf16, #tpu.memory_space<vmem>>, %arg17: memref<1x128xf32, #tpu.memory_space<vmem>>, %arg18: memref<1x1x128xf32, #tpu.memory_space<vmem>>, %arg19: memref<8x128xf32, #tpu.memory_space<vmem>>) attributes {dimension_semantics = [#tpu.dimension_semantics<parallel>, #tpu.dimension_semantics<arbitrary>], iteration_bounds = array<i64: 2, 2>, scalar_prefetch = 0 : i64, scratch_operands = 1 : i64, tpu.core_type = #tpu.core_type<tc>, window_params = [{transform_indices = @transform_0, window_bounds = array<i64: 1, 8, 128>}, {transform_indices = @transform_1, window_bounds = array<i64: 1, 1, 128>}, {transform_indices = @transform_2, window_bounds = array<i64: 1, 1, 128>}, {transform_indices = @transform_3, window_bounds = array<i64: 1, 128, 384>}, {transform_indices = @transform_4, window_bounds = array<i64: 1, 128, 128>}, {transform_indices = @transform_5, window_bounds = array<i64: 1, 1, 128>}, {transform_indices = @transform_6, window_bounds = array<i64: 1, 1, 128>}, {transform_indices = @transform_7, window_bounds = array<i64: 1, 1, 128>}, {transform_indices = @transform_8, window_bounds = array<i64: 1, 128, 256>}, {transform_indices = @transform_9, window_bounds = array<i64: 1, 1, 256>}, {transform_indices = @transform_10, window_bounds = array<i64: 1, 256, 128>}, {transform_indices = @transform_11, window_bounds = array<i64: 1, 1, 128>}, {pipeline_mode = #tpu.pipeline_mode<synchronous>, transform_indices = @transform_12, window_bounds = array<i64: 1, 128>}, {pipeline_mode = #tpu.pipeline_mode<synchronous>, transform_indices = @transform_13, window_bounds = array<i64: 1, 128>}, {pipeline_mode = #tpu.pipeline_mode<synchronous>, transform_indices = @transform_14, window_bounds = array<i64: 128, 128>}, {pipeline_mode = #tpu.pipeline_mode<synchronous>, transform_indices = @transform_15, window_bounds = array<i64: 1, 128>}, {transform_indices = @transform_16, window_bounds = array<i64: 1, 1, 128>}]} {
    %c0_i32 = arith.constant 0 : i32
    %0 = arith.cmpi eq, %arg1, %c0_i32 : i32
    %1 = arith.extui %0 : i1 to i32
    %c0_i32_0 = arith.constant 0 : i32
    %2 = arith.cmpi ne, %1, %c0_i32_0 : i32
    scf.if %2 {
      %c0_67 = arith.constant 0 : index
      %c0_68 = arith.constant 0 : index
      %c0_69 = arith.constant 0 : index
      %159 = vector.load %arg2[%c0_67, %c0_68, %c0_69] : memref<1x8x128xf32, #tpu.memory_space<vmem>>, vector<1x8x128xf32>
      %160 = vector.shape_cast %159 : vector<1x8x128xf32> to vector<8x128xf32>
      %c0_70 = arith.constant 0 : index
      %c0_71 = arith.constant 0 : index
      %161 = vector.load %arg19[%c0_70, %c0_71] : memref<8x128xf32, #tpu.memory_space<vmem>>, vector<8x128xf32>
      tpu.vector_store %arg19[%c0_70, %c0_71], %160 {strides = array<i32>} : memref<8x128xf32, #tpu.memory_space<vmem>>, vector<8x128xf32>,
    } else {
    }
    %c0 = arith.constant 0 : index
    %c0_1 = arith.constant 0 : index
    %3 = vector.load %arg19[%c0, %c0_1] : memref<8x128xf32, #tpu.memory_space<vmem>>, vector<8x128xf32>
    %c0_2 = arith.constant 0 : index
    %c0_3 = arith.constant 0 : index
    %c0_4 = arith.constant 0 : index
    %4 = vector.load %arg3[%c0_2, %c0_3, %c0_4] : memref<1x1x128xf32, #tpu.memory_space<vmem>>, vector<1x1x128xf32>
    %5 = vector.shape_cast %4 : vector<1x1x128xf32> to vector<1x128xf32>
    %c0_5 = arith.constant 0 : index
    %c0_6 = arith.constant 0 : index
    %c0_7 = arith.constant 0 : index
    %6 = vector.load %arg4[%c0_5, %c0_6, %c0_7] : memref<1x1x128xf32, #tpu.memory_space<vmem>>, vector<1x1x128xf32>
    %7 = vector.shape_cast %6 : vector<1x1x128xf32> to vector<1x128xf32>
    %cst = arith.constant dense<0.000000e+00> : vector<8xf32>
    %8 = vector.multi_reduction <add>, %3, %cst [1] : vector<8x128xf32> to vector<8xf32>
    %9 = vector.shape_cast %8 : vector<8xf32> to vector<8x1xf32>
    %cst_8 = arith.constant 1.280000e+02 : f32
    %10 = vector.broadcast %cst_8 : f32 to vector<8x1xf32>
    %11 = arith.divf %9, %10 : vector<8x1xf32>
    %12 = vector.broadcast %11 : vector<8x1xf32> to vector<8x128xf32>
    %13 = arith.subf %3, %12 : vector<8x128xf32>
    %14 = arith.mulf %13, %13 : vector<8x128xf32>
    %cst_9 = arith.constant dense<0.000000e+00> : vector<8xf32>
    %15 = vector.multi_reduction <add>, %14, %cst_9 [1] : vector<8x128xf32> to vector<8xf32>
    %16 = vector.shape_cast %15 : vector<8xf32> to vector<8x1xf32>
    %cst_10 = arith.constant 1.280000e+02 : f32
    %17 = vector.broadcast %cst_10 : f32 to vector<8x1xf32>
    %18 = arith.divf %16, %17 : vector<8x1xf32>
    %19 = vector.broadcast %11 : vector<8x1xf32> to vector<8x128xf32>
    %20 = arith.subf %3, %19 : vector<8x128xf32>
    %cst_11 = arith.constant 9.99999974E-6 : f32
    %21 = vector.broadcast %cst_11 : f32 to vector<8x1xf32>
    %22 = arith.addf %18, %21 : vector<8x1xf32>
    %23 = math.rsqrt %22 : vector<8x1xf32>
    %24 = vector.broadcast %23 : vector<8x1xf32> to vector<8x128xf32>
    %25 = arith.mulf %20, %24 : vector<8x128xf32>
    %26 = vector.broadcast %5 : vector<1x128xf32> to vector<8x128xf32>
    %27 = arith.mulf %25, %26 : vector<8x128xf32>
    %28 = vector.broadcast %7 : vector<1x128xf32> to vector<8x128xf32>
    %29 = arith.addf %27, %28 : vector<8x128xf32>
    %30 = arith.truncf %29 : vector<8x128xf32> to vector<8x128xbf16>
    %c0_12 = arith.constant 0 : index
    %c0_13 = arith.constant 0 : index
    %c0_14 = arith.constant 0 : index
    %31 = vector.load %arg5[%c0_12, %c0_13, %c0_14] : memref<1x128x384xbf16, #tpu.memory_space<vmem>>, vector<1x128x384xbf16>
    %32 = vector.shape_cast %31 : vector<1x128x384xbf16> to vector<128x384xbf16>
    %cst_15 = arith.constant dense<0.000000e+00> : vector<8x384xf32>
    %33 = tpu.matmul %30, %32, %cst_15 {dimension_numbers = #tpu.dot_dimension_numbers<[1], [0], [0], [1], [0, 0, 1, 1], [], []>} : vector<8x128xbf16>, vector<128x384xbf16>, vector<8x384xf32> -> vector<8x384xf32>
    %34 = vector.shape_cast %33 : vector<8x384xf32> to vector<1x8x384xf32>
    %35 = tpu.iota {dimensions = array<i32: 2>} : vector<1x1x8xi32>
    %c5_i32 = arith.constant 5 : i32
    %36 = vector.broadcast %c5_i32 : i32 to vector<1x1x8xi32>
    %37 = arith.cmpi slt, %35, %36 : vector<1x1x8xi32>
    %38 = vector.extract_strided_slice %34 {offsets = [0, 0, 0], sizes = [1, 8, 64], strides = [1, 1, 1]} : vector<1x8x384xf32> to vector<1x8x64xf32>
    %39 = arith.truncf %38 : vector<1x8x64xf32> to vector<1x8x64xbf16>
    %40 = vector.extract_strided_slice %34 {offsets = [0, 0, 128], sizes = [1, 8, 64], strides = [1, 1, 1]} : vector<1x8x384xf32> to vector<1x8x64xf32>
    %41 = arith.truncf %40 : vector<1x8x64xf32> to vector<1x8x64xbf16>
    %42 = vector.extract_strided_slice %34 {offsets = [0, 0, 256], sizes = [1, 8, 64], strides = [1, 1, 1]} : vector<1x8x384xf32> to vector<1x8x64xf32>
    %43 = arith.truncf %42 : vector<1x8x64xf32> to vector<1x8x64xbf16>
    "tpu.trace_start"() <{level = 10 : i32, message = "bqd,bkd->bqk"}> : () -> ()
    %cst_16 = arith.constant dense<0.000000e+00> : vector<1x8x8xf32>
    %44 = tpu.matmul %39, %41, %cst_16 {dimension_numbers = #tpu.dot_dimension_numbers<[2], [2], [1], [1], [0, 0, 0, 1, 1, 1], [0], [0]>} : vector<1x8x64xbf16>, vector<1x8x64xbf16>, vector<1x8x8xf32> -> vector<1x8x8xf32>
    "tpu.trace_stop"() : () -> ()
    %cst_17 = arith.constant 1.250000e-01 : f32
    %45 = vector.broadcast %cst_17 : f32 to vector<1x8x8xf32>
    %46 = arith.mulf %44, %45 : vector<1x8x8xf32>
    %cst_18 = arith.constant 0xFF800000 : f32
    %47 = vector.shape_cast %37 : vector<1x1x8xi1> to vector<1x1x8xi1>
    %48 = vector.broadcast %47 : vector<1x1x8xi1> to vector<1x8x8xi1>
    %49 = vector.broadcast %cst_18 : f32 to vector<1x8x8xf32>
    %50 = arith.select %48, %46, %49 : vector<1x8x8xi1>, vector<1x8x8xf32>
    %cst_19 = arith.constant dense<0xFF800000> : vector<1x8xf32>
    %51 = vector.multi_reduction <maximumf>, %50, %cst_19 [2] : vector<1x8x8xf32> to vector<1x8xf32>
    %52 = vector.shape_cast %51 : vector<1x8xf32> to vector<1x8x1xf32>
    %53 = vector.broadcast %52 : vector<1x8x1xf32> to vector<1x8x8xf32>
    %54 = arith.subf %50, %53 : vector<1x8x8xf32>
    %55 = math.exp %54 : vector<1x8x8xf32>
    %cst_20 = arith.constant dense<0.000000e+00> : vector<1x8xf32>
    %56 = vector.multi_reduction <add>, %55, %cst_20 [2] : vector<1x8x8xf32> to vector<1x8xf32>
    %57 = vector.shape_cast %56 : vector<1x8xf32> to vector<1x8x1xf32>
    %58 = tpu.reciprocal %57 {approx = true} : vector<1x8x1xf32> -> vector<1x8x1xf32>
    %59 = vector.broadcast %58 : vector<1x8x1xf32> to vector<1x8x8xf32>
    %60 = arith.mulf %55, %59 : vector<1x8x8xf32>
    %61 = arith.truncf %60 : vector<1x8x8xf32> to vector<1x8x8xbf16>
    "tpu.trace_start"() <{level = 10 : i32, message = "bqk,bkd->bqd"}> : () -> ()
    %cst_21 = arith.constant dense<0.000000e+00> : vector<1x8x64xf32>
    %62 = tpu.matmul %61, %43, %cst_21 {dimension_numbers = #tpu.dot_dimension_numbers<[2], [1], [1], [2], [0, 0, 0, 1, 1, 2], [0], [0]>} : vector<1x8x8xbf16>, vector<1x8x64xbf16>, vector<1x8x64xf32> -> vector<1x8x64xf32>
    "tpu.trace_stop"() : () -> ()
    %63 = vector.extract_strided_slice %34 {offsets = [0, 0, 64], sizes = [1, 8, 64], strides = [1, 1, 1]} : vector<1x8x384xf32> to vector<1x8x64xf32>
    %64 = arith.truncf %63 : vector<1x8x64xf32> to vector<1x8x64xbf16>
    %65 = vector.extract_strided_slice %34 {offsets = [0, 0, 192], sizes = [1, 8, 64], strides = [1, 1, 1]} : vector<1x8x384xf32> to vector<1x8x64xf32>
    %66 = arith.truncf %65 : vector<1x8x64xf32> to vector<1x8x64xbf16>
    %67 = vector.extract_strided_slice %34 {offsets = [0, 0, 320], sizes = [1, 8, 64], strides = [1, 1, 1]} : vector<1x8x384xf32> to vector<1x8x64xf32>
    %68 = arith.truncf %67 : vector<1x8x64xf32> to vector<1x8x64xbf16>
    "tpu.trace_start"() <{level = 10 : i32, message = "bqd,bkd->bqk"}> : () -> ()
    %cst_22 = arith.constant dense<0.000000e+00> : vector<1x8x8xf32>
    %69 = tpu.matmul %64, %66, %cst_22 {dimension_numbers = #tpu.dot_dimension_numbers<[2], [2], [1], [1], [0, 0, 0, 1, 1, 1], [0], [0]>} : vector<1x8x64xbf16>, vector<1x8x64xbf16>, vector<1x8x8xf32> -> vector<1x8x8xf32>
    "tpu.trace_stop"() : () -> ()
    %cst_23 = arith.constant 1.250000e-01 : f32
    %70 = vector.broadcast %cst_23 : f32 to vector<1x8x8xf32>
    %71 = arith.mulf %69, %70 : vector<1x8x8xf32>
    %cst_24 = arith.constant 0xFF800000 : f32
    %72 = vector.shape_cast %37 : vector<1x1x8xi1> to vector<1x1x8xi1>
    %73 = vector.broadcast %72 : vector<1x1x8xi1> to vector<1x8x8xi1>
    %74 = vector.broadcast %cst_24 : f32 to vector<1x8x8xf32>
    %75 = arith.select %73, %71, %74 : vector<1x8x8xi1>, vector<1x8x8xf32>
    %cst_25 = arith.constant dense<0xFF800000> : vector<1x8xf32>
    %76 = vector.multi_reduction <maximumf>, %75, %cst_25 [2] : vector<1x8x8xf32> to vector<1x8xf32>
    %77 = vector.shape_cast %76 : vector<1x8xf32> to vector<1x8x1xf32>
    %78 = vector.broadcast %77 : vector<1x8x1xf32> to vector<1x8x8xf32>
    %79 = arith.subf %75, %78 : vector<1x8x8xf32>
    %80 = math.exp %79 : vector<1x8x8xf32>
    %cst_26 = arith.constant dense<0.000000e+00> : vector<1x8xf32>
    %81 = vector.multi_reduction <add>, %80, %cst_26 [2] : vector<1x8x8xf32> to vector<1x8xf32>
    %82 = vector.shape_cast %81 : vector<1x8xf32> to vector<1x8x1xf32>
    %83 = tpu.reciprocal %82 {approx = true} : vector<1x8x1xf32> -> vector<1x8x1xf32>
    %84 = vector.broadcast %83 : vector<1x8x1xf32> to vector<1x8x8xf32>
    %85 = arith.mulf %80, %84 : vector<1x8x8xf32>
    %86 = arith.truncf %85 : vector<1x8x8xf32> to vector<1x8x8xbf16>
    "tpu.trace_start"() <{level = 10 : i32, message = "bqk,bkd->bqd"}> : () -> ()
    %cst_27 = arith.constant dense<0.000000e+00> : vector<1x8x64xf32>
    %87 = tpu.matmul %86, %68, %cst_27 {dimension_numbers = #tpu.dot_dimension_numbers<[2], [1], [1], [2], [0, 0, 0, 1, 1, 2], [0], [0]>} : vector<1x8x8xbf16>, vector<1x8x64xbf16>, vector<1x8x64xf32> -> vector<1x8x64xf32>
    "tpu.trace_stop"() : () -> ()
    %88 = tpu.concatenate %62, %87 in 2 : vector<1x8x64xf32>, vector<1x8x64xf32> -> vector<1x8x128xf32>
    %89 = vector.shape_cast %88 : vector<1x8x128xf32> to vector<8x128xf32>
    %90 = arith.truncf %89 : vector<8x128xf32> to vector<8x128xbf16>
    %c0_28 = arith.constant 0 : index
    %c0_29 = arith.constant 0 : index
    %c0_30 = arith.constant 0 : index
    %91 = vector.load %arg6[%c0_28, %c0_29, %c0_30] : memref<1x128x128xbf16, #tpu.memory_space<vmem>>, vector<1x128x128xbf16>
    %92 = vector.shape_cast %91 : vector<1x128x128xbf16> to vector<128x128xbf16>
    %cst_31 = arith.constant dense<0.000000e+00> : vector<8x128xf32>
    %93 = tpu.matmul %90, %92, %cst_31 {dimension_numbers = #tpu.dot_dimension_numbers<[1], [0], [0], [1], [0, 0, 1, 1], [], []>} : vector<8x128xbf16>, vector<128x128xbf16>, vector<8x128xf32> -> vector<8x128xf32>
    %c0_32 = arith.constant 0 : index
    %c0_33 = arith.constant 0 : index
    %c0_34 = arith.constant 0 : index
    %94 = vector.load %arg7[%c0_32, %c0_33, %c0_34] : memref<1x1x128xf32, #tpu.memory_space<vmem>>, vector<1x1x128xf32>
    %95 = vector.shape_cast %94 : vector<1x1x128xf32> to vector<1x128xf32>
    %96 = vector.broadcast %95 : vector<1x128xf32> to vector<8x128xf32>
    %97 = arith.addf %93, %96 : vector<8x128xf32>
    %98 = arith.addf %3, %97 : vector<8x128xf32>
    %c0_35 = arith.constant 0 : index
    %c0_36 = arith.constant 0 : index
    %c0_37 = arith.constant 0 : index
    %99 = vector.load %arg8[%c0_35, %c0_36, %c0_37] : memref<1x1x128xf32, #tpu.memory_space<vmem>>, vector<1x1x128xf32>
    %100 = vector.shape_cast %99 : vector<1x1x128xf32> to vector<1x128xf32>
    %c0_38 = arith.constant 0 : index
    %c0_39 = arith.constant 0 : index
    %c0_40 = arith.constant 0 : index
    %101 = vector.load %arg9[%c0_38, %c0_39, %c0_40] : memref<1x1x128xf32, #tpu.memory_space<vmem>>, vector<1x1x128xf32>
    %102 = vector.shape_cast %101 : vector<1x1x128xf32> to vector<1x128xf32>
    %cst_41 = arith.constant dense<0.000000e+00> : vector<8xf32>
    %103 = vector.multi_reduction <add>, %98, %cst_41 [1] : vector<8x128xf32> to vector<8xf32>
    %104 = vector.shape_cast %103 : vector<8xf32> to vector<8x1xf32>
    %cst_42 = arith.constant 1.280000e+02 : f32
    %105 = vector.broadcast %cst_42 : f32 to vector<8x1xf32>
    %106 = arith.divf %104, %105 : vector<8x1xf32>
    %107 = vector.broadcast %106 : vector<8x1xf32> to vector<8x128xf32>
    %108 = arith.subf %98, %107 : vector<8x128xf32>
    %109 = arith.mulf %108, %108 : vector<8x128xf32>
    %cst_43 = arith.constant dense<0.000000e+00> : vector<8xf32>
    %110 = vector.multi_reduction <add>, %109, %cst_43 [1] : vector<8x128xf32> to vector<8xf32>
    %111 = vector.shape_cast %110 : vector<8xf32> to vector<8x1xf32>
    %cst_44 = arith.constant 1.280000e+02 : f32
    %112 = vector.broadcast %cst_44 : f32 to vector<8x1xf32>
    %113 = arith.divf %111, %112 : vector<8x1xf32>
    %114 = vector.broadcast %106 : vector<8x1xf32> to vector<8x128xf32>
    %115 = arith.subf %98, %114 : vector<8x128xf32>
    %cst_45 = arith.constant 9.99999974E-6 : f32
    %116 = vector.broadcast %cst_45 : f32 to vector<8x1xf32>
    %117 = arith.addf %113, %116 : vector<8x1xf32>
    %118 = math.rsqrt %117 : vector<8x1xf32>
    %119 = vector.broadcast %118 : vector<8x1xf32> to vector<8x128xf32>
    %120 = arith.mulf %115, %119 : vector<8x128xf32>
    %121 = vector.broadcast %100 : vector<1x128xf32> to vector<8x128xf32>
    %122 = arith.mulf %120, %121 : vector<8x128xf32>
    %123 = vector.broadcast %102 : vector<1x128xf32> to vector<8x128xf32>
    %124 = arith.addf %122, %123 : vector<8x128xf32>
    %125 = arith.truncf %124 : vector<8x128xf32> to vector<8x128xbf16>
    %c0_46 = arith.constant 0 : index
    %c0_47 = arith.constant 0 : index
    %c0_48 = arith.constant 0 : index
    %126 = vector.load %arg10[%c0_46, %c0_47, %c0_48] : memref<1x128x256xbf16, #tpu.memory_space<vmem>>, vector<1x128x256xbf16>
    %127 = vector.shape_cast %126 : vector<1x128x256xbf16> to vector<128x256xbf16>
    %cst_49 = arith.constant dense<0.000000e+00> : vector<8x256xf32>
    %128 = tpu.matmul %125, %127, %cst_49 {dimension_numbers = #tpu.dot_dimension_numbers<[1], [0], [0], [1], [0, 0, 1, 1], [], []>} : vector<8x128xbf16>, vector<128x256xbf16>, vector<8x256xf32> -> vector<8x256xf32>
    %c0_50 = arith.constant 0 : index
    %c0_51 = arith.constant 0 : index
    %c0_52 = arith.constant 0 : index
    %129 = vector.load %arg11[%c0_50, %c0_51, %c0_52] : memref<1x1x256xf32, #tpu.memory_space<vmem>>, vector<1x1x256xf32>
    %130 = vector.shape_cast %129 : vector<1x1x256xf32> to vector<1x256xf32>
    %131 = vector.broadcast %130 : vector<1x256xf32> to vector<8x256xf32>
    %132 = arith.addf %128, %131 : vector<8x256xf32>
    %133 = arith.mulf %132, %132 : vector<8x256xf32>
    %134 = arith.mulf %132, %133 : vector<8x256xf32>
    %cst_53 = arith.constant 4.471500e-02 : f32
    %135 = vector.broadcast %cst_53 : f32 to vector<8x256xf32>
    %136 = arith.mulf %135, %134 : vector<8x256xf32>
    %137 = arith.addf %132, %136 : vector<8x256xf32>
    %cst_54 = arith.constant 0.797884583 : f32
    %138 = vector.broadcast %cst_54 : f32 to vector<8x256xf32>
    %139 = arith.mulf %138, %137 : vector<8x256xf32>
    %140 = math.tanh %139 : vector<8x256xf32>
    %cst_55 = arith.constant 1.000000e+00 : f32
    %141 = vector.broadcast %cst_55 : f32 to vector<8x256xf32>
    %142 = arith.addf %141, %140 : vector<8x256xf32>
    %cst_56 = arith.constant 5.000000e-01 : f32
    %143 = vector.broadcast %cst_56 : f32 to vector<8x256xf32>
    %144 = arith.mulf %143, %142 : vector<8x256xf32>
    %145 = arith.mulf %132, %144 : vector<8x256xf32>
    %146 = arith.truncf %145 : vector<8x256xf32> to vector<8x256xbf16>
    %c0_57 = arith.constant 0 : index
    %c0_58 = arith.constant 0 : index
    %c0_59 = arith.constant 0 : index
    %147 = vector.load %arg12[%c0_57, %c0_58, %c0_59] : memref<1x256x128xbf16, #tpu.memory_space<vmem>>, vector<1x256x128xbf16>
    %148 = vector.shape_cast %147 : vector<1x256x128xbf16> to vector<256x128xbf16>
    %cst_60 = arith.constant dense<0.000000e+00> : vector<8x128xf32>
    %149 = tpu.matmul %146, %148, %cst_60 {dimension_numbers = #tpu.dot_dimension_numbers<[1], [0], [0], [1], [0, 0, 1, 1], [], []>} : vector<8x256xbf16>, vector<256x128xbf16>, vector<8x128xf32> -> vector<8x128xf32>
    %150 = arith.addf %98, %149 : vector<8x128xf32>
    %c0_61 = arith.constant 0 : index
    %c0_62 = arith.constant 0 : index
    %c0_63 = arith.constant 0 : index
    %151 = vector.load %arg13[%c0_61, %c0_62, %c0_63] : memref<1x1x128xf32, #tpu.memory_space<vmem>>, vector<1x1x128xf32>
    %152 = vector.shape_cast %151 : vector<1x1x128xf32> to vector<1x128xf32>
    %153 = vector.broadcast %152 : vector<1x128xf32> to vector<8x128xf32>
    %154 = arith.addf %150, %153 : vector<8x128xf32>
    %c0_64 = arith.constant 0 : index
    %c0_65 = arith.constant 0 : index
    %155 = vector.load %arg19[%c0_64, %c0_65] : memref<8x128xf32, #tpu.memory_space<vmem>>, vector<8x128xf32>
    tpu.vector_store %arg19[%c0_64, %c0_65], %154 {strides = array<i32>} : memref<8x128xf32, #tpu.memory_space<vmem>>, vector<8x128xf32>,
    %c1_i32 = arith.constant 1 : i32
    %156 = arith.cmpi eq, %arg1, %c1_i32 : i32
    %157 = arith.extui %156 : i1 to i32
    %c0_i32_66 = arith.constant 0 : i32
    %158 = arith.cmpi ne, %157, %c0_i32_66 : i32
    scf.if %158 {
      %159 = vector.shape_cast %154 : vector<8x128xf32> to vector<1x8x128xf32>
      %160 = vector.extract_strided_slice %159 {offsets = [0, 0, 0], sizes = [1, 1, 128], strides = [1, 1, 1]} : vector<1x8x128xf32> to vector<1x1x128xf32>
      %161 = vector.shape_cast %160 : vector<1x1x128xf32> to vector<1x128xf32>
      %c0_67 = arith.constant 0 : index
      %c0_68 = arith.constant 0 : index
      %162 = vector.load %arg14[%c0_67, %c0_68] : memref<1x128xf32, #tpu.memory_space<vmem>>, vector<1x128xf32>
      %c0_69 = arith.constant 0 : index
      %c0_70 = arith.constant 0 : index
      %163 = vector.load %arg15[%c0_69, %c0_70] : memref<1x128xf32, #tpu.memory_space<vmem>>, vector<1x128xf32>
      %cst_71 = arith.constant dense<0.000000e+00> : vector<1xf32>
      %164 = vector.multi_reduction <add>, %161, %cst_71 [1] : vector<1x128xf32> to vector<1xf32>
      %165 = vector.shape_cast %164 : vector<1xf32> to vector<1x1xf32>
      %cst_72 = arith.constant 1.280000e+02 : f32
      %166 = vector.broadcast %cst_72 : f32 to vector<1x1xf32>
      %167 = arith.divf %165, %166 : vector<1x1xf32>
      %168 = vector.broadcast %167 : vector<1x1xf32> to vector<1x128xf32>
      %169 = arith.subf %161, %168 : vector<1x128xf32>
      %170 = arith.mulf %169, %169 : vector<1x128xf32>
      %cst_73 = arith.constant dense<0.000000e+00> : vector<1xf32>
      %171 = vector.multi_reduction <add>, %170, %cst_73 [1] : vector<1x128xf32> to vector<1xf32>
      %172 = vector.shape_cast %171 : vector<1xf32> to vector<1x1xf32>
      %cst_74 = arith.constant 1.280000e+02 : f32
      %173 = vector.broadcast %cst_74 : f32 to vector<1x1xf32>
      %174 = arith.divf %172, %173 : vector<1x1xf32>
      %175 = vector.broadcast %167 : vector<1x1xf32> to vector<1x128xf32>
      %176 = arith.subf %161, %175 : vector<1x128xf32>
      %cst_75 = arith.constant 9.99999974E-6 : f32
      %177 = vector.broadcast %cst_75 : f32 to vector<1x1xf32>
      %178 = arith.addf %174, %177 : vector<1x1xf32>
      %179 = math.rsqrt %178 : vector<1x1xf32>
      %180 = vector.broadcast %179 : vector<1x1xf32> to vector<1x128xf32>
      %181 = arith.mulf %176, %180 : vector<1x128xf32>
      %182 = arith.mulf %181, %162 : vector<1x128xf32>
      %183 = arith.addf %182, %163 : vector<1x128xf32>
      %184 = arith.truncf %183 : vector<1x128xf32> to vector<1x128xbf16>
      %c0_76 = arith.constant 0 : index
      %c0_77 = arith.constant 0 : index
      %185 = vector.load %arg16[%c0_76, %c0_77] : memref<128x128xbf16, #tpu.memory_space<vmem>>, vector<128x128xbf16>
      %cst_78 = arith.constant dense<0.000000e+00> : vector<1x128xf32>
      %186 = tpu.matmul %184, %185, %cst_78 {dimension_numbers = #tpu.dot_dimension_numbers<[1], [0], [0], [1], [0, 0, 1, 1], [], []>} : vector<1x128xbf16>, vector<128x128xbf16>, vector<1x128xf32> -> vector<1x128xf32>
      %c0_79 = arith.constant 0 : index
      %c0_80 = arith.constant 0 : index
      %187 = vector.load %arg17[%c0_79, %c0_80] : memref<1x128xf32, #tpu.memory_space<vmem>>, vector<1x128xf32>
      %188 = arith.addf %186, %187 : vector<1x128xf32>
      %c0_81 = arith.constant 0 : index
      %c0_82 = arith.constant 0 : index
      %c0_83 = arith.constant 0 : index
      %189 = vector.load %arg18[%c0_81, %c0_82, %c0_83] : memref<1x1x128xf32, #tpu.memory_space<vmem>>, vector<1x1x128xf32>
      %190 = vector.shape_cast %189 : vector<1x1x128xf32> to vector<1x128xf32>
      %191 = vector.shape_cast %188 : vector<1x128xf32> to vector<1x1x128xf32>
      tpu.vector_store %arg18[%c0_81, %c0_82, %c0_83], %191 {strides = array<i32>} : memref<1x1x128xf32, #tpu.memory_space<vmem>>, vector<1x1x128xf32>,
    } else {
    }
    return
  }
  func.func @transform_0(%arg0: i32, %arg1: i32) -> (i32, i32, i32) {
    %c0_i32 = arith.constant 0 : i32
    %c0_i32_0 = arith.constant 0 : i32
    %c0_i32_1 = arith.constant 0 : i32
    return %arg0, %c0_i32, %c0_i32_0 : i32, i32, i32
  }
  func.func @transform_1(%arg0: i32, %arg1: i32) -> (i32, i32, i32) {
    %c0_i32 = arith.constant 0 : i32
    %c0_i32_0 = arith.constant 0 : i32
    %c0_i32_1 = arith.constant 0 : i32
    return %arg1, %c0_i32, %c0_i32_0 : i32, i32, i32
  }
  func.func @transform_2(%arg0: i32, %arg1: i32) -> (i32, i32, i32) {
    %c0_i32 = arith.constant 0 : i32
    %c0_i32_0 = arith.constant 0 : i32
    %c0_i32_1 = arith.constant 0 : i32
    return %arg1, %c0_i32, %c0_i32_0 : i32, i32, i32
  }
  func.func @transform_3(%arg0: i32, %arg1: i32) -> (i32, i32, i32) {
    %c0_i32 = arith.constant 0 : i32
    %c0_i32_0 = arith.constant 0 : i32
    %c0_i32_1 = arith.constant 0 : i32
    return %arg1, %c0_i32, %c0_i32_0 : i32, i32, i32
  }
  func.func @transform_4(%arg0: i32, %arg1: i32) -> (i32, i32, i32) {
    %c0_i32 = arith.constant 0 : i32
    %c0_i32_0 = arith.constant 0 : i32
    %c0_i32_1 = arith.constant 0 : i32
    return %arg1, %c0_i32, %c0_i32_0 : i32, i32, i32
  }
  func.func @transform_5(%arg0: i32, %arg1: i32) -> (i32, i32, i32) {
    %c0_i32 = arith.constant 0 : i32
    %c0_i32_0 = arith.constant 0 : i32
    %c0_i32_1 = arith.constant 0 : i32
    return %arg1, %c0_i32, %c0_i32_0 : i32, i32, i32
  }
  func.func @transform_6(%arg0: i32, %arg1: i32) -> (i32, i32, i32) {
    %c0_i32 = arith.constant 0 : i32
    %c0_i32_0 = arith.constant 0 : i32
    %c0_i32_1 = arith.constant 0 : i32
    return %arg1, %c0_i32, %c0_i32_0 : i32, i32, i32
  }
  func.func @transform_7(%arg0: i32, %arg1: i32) -> (i32, i32, i32) {
    %c0_i32 = arith.constant 0 : i32
    %c0_i32_0 = arith.constant 0 : i32
    %c0_i32_1 = arith.constant 0 : i32
    return %arg1, %c0_i32, %c0_i32_0 : i32, i32, i32
  }
  func.func @transform_8(%arg0: i32, %arg1: i32) -> (i32, i32, i32) {
    %c0_i32 = arith.constant 0 : i32
    %c0_i32_0 = arith.constant 0 : i32
    %c0_i32_1 = arith.constant 0 : i32
    return %arg1, %c0_i32, %c0_i32_0 : i32, i32, i32
  }
  func.func @transform_9(%arg0: i32, %arg1: i32) -> (i32, i32, i32) {
    %c0_i32 = arith.constant 0 : i32
    %c0_i32_0 = arith.constant 0 : i32
    %c0_i32_1 = arith.constant 0 : i32
    return %arg1, %c0_i32, %c0_i32_0 : i32, i32, i32
  }
  func.func @transform_10(%arg0: i32, %arg1: i32) -> (i32, i32, i32) {
    %c0_i32 = arith.constant 0 : i32
    %c0_i32_0 = arith.constant 0 : i32
    %c0_i32_1 = arith.constant 0 : i32
    return %arg1, %c0_i32, %c0_i32_0 : i32, i32, i32
  }
  func.func @transform_11(%arg0: i32, %arg1: i32) -> (i32, i32, i32) {
    %c0_i32 = arith.constant 0 : i32
    %c0_i32_0 = arith.constant 0 : i32
    %c0_i32_1 = arith.constant 0 : i32
    return %arg1, %c0_i32, %c0_i32_0 : i32, i32, i32
  }
  func.func @transform_12(%arg0: i32, %arg1: i32) -> (i32, i32) {
    %c0_i32 = arith.constant 0 : i32
    %c0_i32_0 = arith.constant 0 : i32
    %c0_i32_1 = arith.constant 0 : i32
    return %c0_i32, %c0_i32_0 : i32, i32
  }
  func.func @transform_13(%arg0: i32, %arg1: i32) -> (i32, i32) {
    %c0_i32 = arith.constant 0 : i32
    %c0_i32_0 = arith.constant 0 : i32
    %c0_i32_1 = arith.constant 0 : i32
    return %c0_i32, %c0_i32_0 : i32, i32
  }
  func.func @transform_14(%arg0: i32, %arg1: i32) -> (i32, i32) {
    %c0_i32 = arith.constant 0 : i32
    %c0_i32_0 = arith.constant 0 : i32
    %c0_i32_1 = arith.constant 0 : i32
    return %c0_i32, %c0_i32_0 : i32, i32
  }
  func.func @transform_15(%arg0: i32, %arg1: i32) -> (i32, i32) {
    %c0_i32 = arith.constant 0 : i32
    %c0_i32_0 = arith.constant 0 : i32
    %c0_i32_1 = arith.constant 0 : i32
    return %c0_i32, %c0_i32_0 : i32, i32
  }
  func.func @transform_16(%arg0: i32, %arg1: i32) -> (i32, i32, i32) {
    %c0_i32 = arith.constant 0 : i32
    %c0_i32_0 = arith.constant 0 : i32
    %c0_i32_1 = arith.constant 0 : i32
    return %arg0, %c0_i32, %c0_i32_0 : i32, i32, i32
  }
}

</mosaic_0001>

<bundles_post_ra>
// kernel: salclass_forward.1
= control target key start
LH: loop header
LB: loop body
LE: loop exit
PB: predicated region body
PF: predicated region fallthrough
CT: control target
= control target key end

     0   :  { %s2883_s0 = inlined_call_operand.vmem [shape: f32[2,8,128], index: 0, kind: input, shape index: {}]   ;;  %s2884_s1 = inlined_call_operand.vmem [shape: f32[2,1,128], index: 1, kind: input, shape index: {}]   ;;  %s2885_s2 = inlined_call_operand.vmem [shape: f32[2,1,128], index: 2, kind: input, shape index: {}]   ;;  %s2886_s3 = inlined_call_operand.vmem [shape: bf16[2,128,384], index: 3, kind: input, shape index: {}]   ;;  %s2887_s4 = inlined_call_operand.vmem [shape: bf16[2,128,128], index: 4, kind: input, shape index: {}]   ;;  %s2888_s5 = inlined_call_operand.vmem [shape: f32[2,1,128], index: 5, kind: input, shape index: {}]   ;;  %s2889_s6 = inlined_call_operand.vmem [shape: f32[2,1,128], index: 6, kind: input, shape index: {}]   ;;  %s2890_s7 = inlined_call_operand.vmem [shape: f32[2,1,128], index: 7, kind: input, shape index: {}]   ;;  %s2891_s8 = inlined_call_operand.vmem [shape: bf16[2,128,256], index: 8, kind: input, shape index: {}]   ;;  %s2892_s9 = inlined_call_operand.vmem [shape: f32[2,1,256], index: 9, kind: input, shape index: {}]   ;;  %s2893_s10 = inlined_call_operand.vmem [shape: bf16[2,256,128], index: 10, kind: input, shape index: {}]   ;;  %s2894_s11 = inlined_call_operand.vmem [shape: f32[2,1,128], index: 11, kind: input, shape index: {}]   ;;  %s2895_s12 = inlined_call_operand.vmem [shape: f32[1,128], index: 12, kind: input, shape index: {}]   ;;  %s2896_s13 = inlined_call_operand.vmem [shape: f32[1,128], index: 13, kind: input, shape index: {}]   ;;  %s2897_s14 = inlined_call_operand.vmem [shape: bf16[128,128], index: 14, kind: input, shape index: {}]   ;;  %s2898_s15 = inlined_call_operand.vmem [shape: f32[1,128], index: 15, kind: input, shape index: {}]   ;;  %s2899_s16 = inlined_call_operand.hbm [shape: f32[2,1,128], index: 16, kind: output, shape index: {}]  }
   0x1   :  { %2914 = sst [smem:[#allocation18_spill]] %s2883_s0 }
   0x2   :  { %2915 = sst [smem:[#allocation19_spill]] %s2888_s5 }
   0x3   :  { %2916 = sst [smem:[#allocation20_spill]] %s2895_s12 }
   0x4   :  { %2917 = sst [smem:[#allocation21_spill]] %s2896_s13 }
   0x5   :  { %2918 = sst [smem:[#allocation22_spill]] %s2897_s14 }
   0x6   :  { %2919 = sst [smem:[#allocation23_spill]] %s2898_s15 }
   0x7   :  { %2920 = sst [smem:[#allocation24_spill]] %s2899_s16 }
   0x8   :  { %21 = vsyncpa [#allocation4], 0 }
   0x9   :  { %23 = vsyncpa [#allocation4 + $0x1], 0  ;;  %s2484_s21 = smov 0   ;;  %s2486_s22 = smov 0  }
   0xa   :  { %s2488_s23 = smov 0   ;;  %s2490_s24 = smov 0  }
   0xb   :  { %s2492_s25 = smov 0   ;;  %s2494_s26 = smov 0  }
   0xc   :  { %s2496_s27 = smov 0   ;;  %s2498_s28 = smov 0  }
   0xd LB: > { %2921 = sst [smem:[#allocation6_spill]] %s2367_s21  ;;  %s1816_s29 = sadd.s32 4294967295, %s2395_s28   ;;  %s2395_s28 = sphi %s2498_s28, %s29_s28   ;;  %s2391_s27 = sphi %s2496_s27, %s2962_s27   ;;  %s2387_s26 = sphi %s2494_s26, %s2961_s26   ;;  %s2383_s25 = sphi %s2492_s25, %s2960_s25   ;;  %s2379_s24 = sphi %s2490_s24, %s2959_s24   ;;  %s2375_s23 = sphi %s2488_s23, %s2958_s23   ;;  %s2371_s22 = sphi %s2486_s22, %s2964_s22   ;;  %s2367_s21 = sphi %s2484_s21, %s2963_s21  }
   0xe   : > { %2922 = sst [smem:[#allocation7_spill]] %s2375_s23  ;;  %s1817_s30 = sadd.s32 4294967294, %s2395_s28  }
   0xf   : > { %2923 = sst [smem:[#allocation8_spill]] %s2379_s24  ;;  %s38_s0 = sadd.s32 1, %s2387_s26 }
  0x10   : > { %2924 = sst [smem:[#allocation9_spill]] %s2383_s25  ;;  %p39_p0 = scmp.ge.s32.totalorder %s38_s0, 2 }
  0x11   : > { %2925 = sst [smem:[#allocation10_spill]] %s2387_s26  ;;  %s41_s17 = sadd.s32 1, %s2391_s27 }
  0x12   : > { %2926 = sst [smem:[#allocation11_spill]] %s2391_s27  ;;  %p454_p1 = scmp.ne.s32.totalorder %s2375_s23, %s2371_s22 }
  0x13   : > { %2927 = sst [smem:[#allocation12_spill]] %s2395_s28  ;;  %p455_p2 = scmp.eq.s32.totalorder %s1816_s29, 3 }
  0x14   : > { %s2966_s0 = smov (%p39_p0, %s38_s0), 0  ;;  %s2968_s17 = smov (!%p39_p0, %s41_s17), %s2391_s27 }
  0x15   : > { %2928 = sst [smem:[#allocation13_spill]] %s2966_s0  ;;  %p2533_p3 = por %p455_p2, %p454_p1 }
  0x16   : > { %p460_p4 = scmp.ne.s32.totalorder %s2371_s22, %s2367_s21  ;;  %p43_p5 = scmp.ge.s32.totalorder %s2968_s17, 2 }
  0x17   : > { %s2929_s18 = scalar_select %p2533_p3, 1, 0 }
  0x18   : > { %p461_p6 = scmp.eq.s32.totalorder %s1817_s30, 3  ;;  %p1820_p7 = scmp.ge.s32.totalorder %s2395_s28, 1 }
  0x19   : > { %2930 = sst [smem:[#allocation14_spill]] %s2929_s18  ;;  %p573_p8 = scmp.lt.s32.totalorder %s2395_s28, 5 }
  0x1a   : > { %s2970_s17 = smov (%p43_p5, %s2968_s17), 0  ;;  %p2543_p9 = por %p461_p6, %p460_p4 }
  0x1b   : > { %2931 = sst [smem:[#allocation15_spill]] %s2970_s17  ;;  %p574_p10 = pnand %p1820_p7, %p573_p8 }
  0x1c   : > { %s2932_s19 = scalar_select %p2543_p9, 1, 0 }
  0x1d   : > { %s441_s20 = ssub.s32 %s2391_s27, %s2970_s17  ;;  %s444_s29 = sadd.s32 1, %s2375_s23 }
  0x1e   : > { %2933 = sst [smem:[#allocation16_spill]] %s2932_s19  ;;  %p442_p11 = scmp.eq.s32.totalorder %s441_s20, 0 }
  0x1f   : > { %577 = sbr.rel (%p574_p10) target bundleno = 2624 (0xa40), region = 84  ;;  %p663_p12 = scmp.lt.s32.totalorder (!%p574_p10), %s2383_s25, 1 }
  0x20   : > { %s2551_s0 = scalar_select %p442_p11, %s2375_s23, %s444_s29  }
  0x21   : > { %p667_p13 = scmp.lt.s32.totalorder (!%p574_p10), %s2379_s24, 1  ;;  %s2935_s27 = sld [smem:[#allocation18_spill]] (!%p574_p10) }
  0x22   : > { %2934 = sst [smem:[#allocation17_spill]] %s2551_s0  ;;  %s2937_s19 = sand.u32 (!%p574_p10), 1, %s2371_s22  }
  0x23   : > { %s2618_s28 = scalar_lea.vmem (!%p574_p10), [#allocation3], %s2937_s19  ;;  %s2938_s5 = sld [smem:[#allocation8_spill]] (!%p574_p10) }
  0x24   : > { %s664_s26 = scalar_select %p663_p12, %s2383_s25, 1 }
  0x25   : > { %s2558_s21 = scalar_select %p667_p13, %s2379_s24, 1 }
  0x26   : > { %s1821_s20 = sshll.u32 %s664_s26, 3 }
  0x27   : > { %s666_s30 = scalar_lea.vmem %s2935_s27, %s1821_s20  ;;  %s2201_s25 = smul.u32 192, %s2558_s21 }
  0x28   : > { %s2126_s15 = sshll.u32 %s2558_s21, 6  ;;  %s2127_s12 = sshll.u32 %s2558_s21, 7 }
  0x29   : > { %s2580_s17 = scalar_lea.vmem %s2886_s3, %s2201_s25  ;;  %s2585_s23 = scalar_lea.vmem %s2887_s4, %s2126_s15 }
  0x2a   : > { %s1827_s13 = sshll.u32 %s2558_s21, 1  ;;  %s2600_s14 = scalar_lea.vmem %s2891_s8, %s2127_s12 }
  0x2b   : > { %s2605_s15 = scalar_lea.vmem %s2892_s9, %s1827_s13  ;;  %s2610_s0 = scalar_lea.vmem %s2893_s10, %s2127_s12 }
  0x2c   : > { %s708_s18 = scalar_lea.vmem %s2894_s11, %s2558_s21  ;;  %p1830_p0 = scmp.ne.s32.totalorder %s2938_s5, 0 }
  0x2e   : > { %713 = sbr.rel (%p1830_p0) target bundleno = 53 (0x35), region = 88 }
  0x33   : > { %v714_v0 = vld [vmem:[%s666_s30] sm:$0xff] }
  0x34   : > { %715 = vst [vmem:[#allocation2] sm:$0xff] %v714_v0 }
  0x35 PF: > { %v2397_v2 = vmov 128.0   ;;  %v1917_v3 = vld [vmem:[%s2580_s17 + $0xa8] sm:$0xf]  ;;  %v2151_v4 = vld [vmem:[%s2580_s17 + $0xb0] sm:$0xf0]  ;;  %s2939_s26 = scalar_lea.vmem %s2884_s1, %s2558_s21  ;;  %s2940_s13 = scalar_lea.vmem %s2885_s2, %s2558_s21  ;;  %vm960_vm4 = vcmask 523264  }
  0x36   : > { %2281 = vrcp.f32 %v2397_v2  ;;  %v2150_v5 = vld [vmem:[%s2580_s17 + $0xac] sm:$0xf]  ;;  %v1918_v6 = vor.u32 %v2151_v4, %v1917_v3  ;;  %v1919_v7 = vld [vmem:[%s2580_s17 + $0xb4] sm:$0xf0]  ;;  %v1925_v8 = vld [vmem:[%s2580_s17 + $0xb0] sm:$0xf]  ;;  %s2943_s16 = scalar_lea.vmem %s2889_s6, %s2558_s21  ;;  %s2944_s30 = scalar_lea.vmem %s2890_s7, %s2558_s21 }
  0x37   : > { %v2152_v9 = vld [vmem:[%s2580_s17 + $0xb8] sm:$0xf0]  ;;  %v1922_v10 = vor.u32 %v2150_v5, %v1919_v7  ;;  %v1905_v22 = vld [vmem:[%s2580_s17 + $0x90] sm:$0xf]  ;;  %v2147_v24 = vld [vmem:[%s2580_s17 + $0x94] sm:$0xf] }
  0x38   : > { %v1926_v11 = vor.u32 %v2152_v9, %v1925_v8  ;;  %915 = vmatpush.bf16.msra.mxu0 %v1918_v6  ;;  %v2148_v23 = vld [vmem:[%s2580_s17 + $0x98] sm:$0xf0]  ;;  %v1907_v26 = vld [vmem:[%s2580_s17 + $0x9c] sm:$0xf0]  ;;  %v1913_v27 = vld [vmem:[%s2580_s17 + $0x98] sm:$0xf] }
  0x39   : > { %928 = vmatpush.bf16.msra.mxu1 %v1922_v10  ;;  %v1906_v25 = vor.u32 %v2148_v23, %v1905_v22  ;;  %v2149_v28 = vld [vmem:[%s2580_s17 + $0xa0] sm:$0xf0]  ;;  %v1910_v29 = vor.u32 %v2147_v24, %v1907_v26  ;;  %v1893_v31 = vld [vmem:[%s2580_s17 + $0x78] sm:$0xf]  ;;  %v2144_v33 = vld [vmem:[%s2580_s17 + $0x7c] sm:$0xf] }
  0x3a   : > { %941 = vmatpush.bf16.msra.mxu2 %v1926_v11  ;;  %v1914_v30 = vor.u32 %v2149_v28, %v1913_v27  ;;  %v2145_v32 = vld [vmem:[%s2580_s17 + $0x80] sm:$0xf0]  ;;  %v1895_v35 = vld [vmem:[%s2580_s17 + $0x84] sm:$0xf0]  ;;  %v1901_v36 = vld [vmem:[%s2580_s17 + $0x80] sm:$0xf] }
  0x3b   : > { %v2621_v1 = vld [vmem:[#allocation2] sm:$0xff]  ;;  %v1894_v34 = vor.u32 %v2145_v32, %v1893_v31  ;;  %v2146_v37 = vld [vmem:[%s2580_s17 + $0x88] sm:$0xf0]  ;;  %v1898_v38 = vor.u32 %v2144_v33, %v1895_v35  ;;  %v1883_v44 = vld [vmem:[%s2580_s17 + $0x6c] sm:$0xf0]  ;;  %s2398_s24 = smov 64  }
  0x3c   : > { %719 = vadd.xlane.f32.xlu0 %v2621_v1  ;;  %v2282_v12 = vpop.eup %2281  ;;  %916 = vmatpush.bf16.msra.mxu0 %v1906_v25  ;;  %v1902_v39 = vor.u32 %v2146_v37, %v1901_v36  ;;  %v1881_v40 = vld [vmem:[%s2580_s17 + $0x60] sm:$0xf]  ;;  %v2142_v41 = vld [vmem:[%s2580_s17 + $0x68] sm:$0xf0]  ;;  %v2141_v42 = vld [vmem:[%s2580_s17 + $0x64] sm:$0xf] }
  0x3d   : > { %v722_v13 = vmul.f32 128.0, %v2282_v12  ;;  %vm726_vm0 = vweird.f32 %v2282_v12  ;;  %929 = vmatpush.bf16.msra.mxu1 %v1910_v29  ;;  %v1882_v43 = vor.u32 %v2142_v41, %v1881_v40  ;;  %v1889_v45 = vld [vmem:[%s2580_s17 + $0x68] sm:$0xf]  ;;  %v2143_v46 = vld [vmem:[%s2580_s17 + $0x70] sm:$0xf0]  ;;  %v1886_v47 = vor.u32 %v2141_v42, %v1883_v44  ;;  %s2941_s20 = sld [smem:[#allocation19_spill]] }
  0x3e   : > { %942 = vmatpush.bf16.msra.mxu2 %v1914_v30  ;;  %v1890_v48 = vor.u32 %v2143_v46, %v1889_v45  ;;  %v1869_v49 = vld [vmem:[%s2580_s17 + $0x48] sm:$0xf]  ;;  %v2139_v50 = vld [vmem:[%s2580_s17 + $0x50] sm:$0xf0]  ;;  %v2138_v51 = vld [vmem:[%s2580_s17 + $0x4c] sm:$0xf] }
  0x3f   : > { %v723_v14 = vsub.f32 1.0, %v722_v13  ;;  %v1870_v52 = vor.u32 %v2139_v50, %v1869_v49  ;;  %v1871_v53 = vld [vmem:[%s2580_s17 + $0x54] sm:$0xf0]  ;;  %v1877_v54 = vld [vmem:[%s2580_s17 + $0x50] sm:$0xf]  ;;  %vm1000_vm5 = vcmask 1043456  }
  0x40   : > { %917 = vmatpush.bf16.msra.mxu0 %v1894_v34  ;;  %v2140_v55 = vld [vmem:[%s2580_s17 + $0x58] sm:$0xf0]  ;;  %v1874_v56 = vor.u32 %v2138_v51, %v1871_v53  ;;  %v1857_v58 = vld [vmem:[%s2580_s17 + $0x30] sm:$0xf]  ;;  %v2135_v60 = vld [vmem:[%s2580_s17 + $0x34] sm:$0xf] }
  0x41   : > { %v724_v15 = vmul.f32 %v2282_v12, %v723_v14  ;;  %930 = vmatpush.bf16.msra.mxu1 %v1898_v38  ;;  %v1878_v57 = vor.u32 %v2140_v55, %v1877_v54  ;;  %v2136_v59 = vld [vmem:[%s2580_s17 + $0x38] sm:$0xf0]  ;;  %v1859_v62 = vld [vmem:[%s2580_s17 + $0x3c] sm:$0xf0]  ;;  %v1865_v63 = vld [vmem:[%s2580_s17 + $0x38] sm:$0xf] }
  0x42   : > { %943 = vmatpush.bf16.msra.mxu2 %v1902_v39  ;;  %v1858_v61 = vor.u32 %v2136_v59, %v1857_v58  ;;  %v2137_v0 = vld [vmem:[%s2580_s17 + $0x40] sm:$0xf0]  ;;  %v1862_v2 = vor.u32 %v2135_v60, %v1859_v62  ;;  %v1845_v4 = vld [vmem:[%s2580_s17 + $0x18] sm:$0xf]  ;;  %v2132_v6 = vld [vmem:[%s2580_s17 + $0x1c] sm:$0xf] }
  0x43   : > { %v725_v16 = vadd.f32 %v2282_v12, %v724_v15  ;;  %v1866_v3 = vor.u32 %v2137_v0, %v1865_v63  ;;  %v2133_v5 = vld [vmem:[%s2580_s17 + $0x20] sm:$0xf0]  ;;  %v1847_v8 = vld [vmem:[%s2580_s17 + $0x24] sm:$0xf0]  ;;  %v1853_v9 = vld [vmem:[%s2580_s17 + $0x20] sm:$0xf]  ;;  %s2942_s29 = scalar_lea.vmem %s2941_s20, %s2558_s21 }
  0x44   : > { %918 = vmatpush.bf16.msra.mxu0 %v1882_v43  ;;  %v1846_v7 = vor.u32 %v2133_v5, %v1845_v4  ;;  %v2134_v10 = vld [vmem:[%s2580_s17 + $0x28] sm:$0xf0]  ;;  %v1850_v11 = vor.u32 %v2132_v6, %v1847_v8  ;;  %v1833_v13 = vld [vmem:[%s2580_s17] sm:$0xf]  ;;  %v2129_v15 = vld [vmem:[%s2580_s17 + $0x4] sm:$0xf] }
  0x45   : > { %v2630_v17 = vsel %vm726_vm0, %v2282_v12, %v725_v16  ;;  %931 = vmatpush.bf16.msra.mxu1 %v1886_v47  ;;  %v1854_v12 = vor.u32 %v2134_v10, %v1853_v9  ;;  %v2130_v14 = vld [vmem:[%s2580_s17 + $0x8] sm:$0xf0]  ;;  %v2275_v33 = vld [vmem:[%s2939_s26] ss:$0 sm:$0xff]  ;;  %vm984_vm7 = vcmask 64512   ;;  %s2945_s26 = sld [smem:[#allocation8_spill]] }
  0x46   : > { %944 = vmatpush.bf16.msra.mxu2 %v1890_v48  ;;  %v1834_v16 = vor.u32 %v2130_v14, %v1833_v13  ;;  %v2276_v36 = vld [vmem:[%s2940_s13] ss:$0 sm:$0xff] }
  0x48   : > { %919 = vmatpush.bf16.msra.mxu0 %v1870_v52 }
  0x49   : > { %932 = vmatpush.bf16.msra.mxu1 %v1874_v56 }
  0x4a   : > { %945 = vmatpush.bf16.msra.mxu2 %v1878_v57 }
  0x4b   : > { %p2091_p1 = scmp.ne.s32.totalorder %s2945_s26, 1 }
  0x4c   : > { %920 = vmatpush.bf16.msra.mxu0 %v1858_v61  ;;  %v954_v61 = vlaneseq  ;;  %s2946_s13 = sld [smem:[#allocation22_spill]] (!%p2091_p1) }
  0x4d   : > { %933 = vmatpush.bf16.msra.mxu1 %v1862_v2  ;;  %s2949_s27 = sld [smem:[#allocation23_spill]] (!%p2091_p1) }
  0x4e   : > { %946 = vmatpush.bf16.msra.mxu2 %v1866_v3  ;;  %v955_v62 = vand.u32 127, %v954_v61 }
  0x50   : > { %921 = vmatpush.bf16.msra.mxu0 %v1846_v7  ;;  %vm956_vm6 = vcmp.lt.s32.totalorder %v955_v62, 5  ;;  %v2015_v62 = vld [vmem:[%s2600_s14 + $0x68] sm:$0xf0] }
  0x51   : > { %934 = vmatpush.bf16.msra.mxu1 %v1850_v11 }
  0x52   : > { %947 = vmatpush.bf16.msra.mxu2 %v1854_v12 }
  0x54   : > { %922 = vmatpush.bf16.msra.mxu0 %v1834_v16 }
  0xaf   : > { %v720_v18 = vpop.xlane.xlu0 %719 }
  0xb0   : > { %v728_v19 = vmul.f32 %v2630_v17, %v720_v18  ;;  %v1835_v18 = vld [vmem:[%s2580_s17 + $0xc] sm:$0xf0] }
  0xb1   : > { %v1838_v22 = vor.u32 %v2129_v15, %v1835_v18 }
  0xb2   : > { %v2634_v20 = vsub.f32 %v2621_v1, %v728_v19  ;;  %v1841_v19 = vld [vmem:[%s2580_s17 + $0x8] sm:$0xf] }
  0xb3   : > { %935 = vmatpush.bf16.msra.mxu1 %v1838_v22 }
  0xb4   : > { %v730_v21 = vmul.f32 %v2634_v20, %v2634_v20 }
  0xb6   : > { %731 = vadd.xlane.f32.xlu0 %v730_v21  ;;  %v2131_v21 = vld [vmem:[%s2580_s17 + $0x10] sm:$0xf0]  ;;  %s2947_s17 = sld [smem:[#allocation20_spill]] (!%p2091_p1) }
  0xb7   : > { %v1842_v23 = vor.u32 %v2131_v21, %v1841_v19 }
  0xb9   : > { %948 = vmatpush.bf16.msra.mxu2 %v1842_v23 }
 0x129   : > { %v732_v24 = vpop.xlane.xlu0 %731 }
 0x12a   : > { %v733_v25 = vmul.f32 %v732_v24, %v2630_v17 }
 0x12c   : > { %v734_v26 = vadd.f32 1e-05, %v733_v25 }
 0x12e   : > { %2283 = vrsqrt.f32 %v734_v26  ;;  %vm741_vm2 = vweird.f32 %v734_v26 }
 0x134   : > { %v2284_v27 = vpop.eup %2283 }
 0x135   : > { %v736_v28 = vmul.f32 %v2284_v27, %v734_v26  ;;  %vm742_vm1 = vweird.f32 %v2284_v27 }
 0x136   : > { %vm743_vm3 = vmor %vm741_vm2, %vm742_vm1 }
 0x137   : > { %v737_v29 = vmul.f32 %v2284_v27, %v736_v28 }
 0x139   : > { %v738_v30 = vmul.f32 0.5, %v737_v29 }
 0x13b   : > { %v739_v31 = vsub.f32 1.5, %v738_v30 }
 0x13d   : > { %v740_v32 = vmul.f32 %v2284_v27, %v739_v31 }
 0x13f   : > { %v744_v34 = vsel %vm743_vm3, %v2284_v27, %v740_v32  ;;  %v2160_v32 = vld [vmem:[%s2585_s23 + $0x38] sm:$0xff] }
 0x140   : > { %v745_v35 = vmul.f32 %v744_v34, %v2634_v20  ;;  %1158 = vmatpush.bf16.msrb.mxu1 %v2160_v32  ;;  %v2158_v34 = vld [vmem:[%s2585_s23 + $0x28] sm:$0xff]  ;;  %v1965_v32 = vld [vmem:[%s2600_s14] sm:$0xf] }
 0x142   : > { %v749_v37 = vmul.f32 %v2275_v33, %v745_v35  ;;  %v2159_v33 = vld [vmem:[%s2585_s23 + $0x30] sm:$0xff]  ;;  %v2157_v35 = vld [vmem:[%s2585_s23 + $0x20] sm:$0xff] }
 0x144   : > { %v753_v38 = vadd.f32 %v2276_v36, %v749_v37  ;;  %1159 = vmatpush.bf16.msrb.mxu1 %v2159_v33  ;;  %v2156_v36 = vld [vmem:[%s2585_s23 + $0x18] sm:$0xff]  ;;  %v2155_v37 = vld [vmem:[%s2585_s23 + $0x10] sm:$0xff]  ;;  %v2162_v33 = vld [vmem:[%s2600_s14 + $0x4] sm:$0xf0] }
 0x146   : > { %v754_v39 = vpack.c.bf16 %v753_v38, %v753_v38  ;;  %v2154_v38 = vld [vmem:[%s2585_s23 + $0x8] sm:$0xff] }
 0x148   : > { %923 = vmatmul.bf16.vlgmr.msra.gmra.mxu0 %v754_v39  ;;  %936 = vmatmul.bf16.vlgmr.msra.gmra.mxu1 %v754_v39 }
 0x149   : > { %949 = vmatmul.bf16.vlgmr.msra.gmra.mxu2 %v754_v39  ;;  %1160 = vmatpush.bf16.msrb.mxu1 %v2158_v34 }
 0x14d   : > { %1161 = vmatpush.bf16.msrb.mxu1 %v2157_v35  ;;  %v2161_v35 = vld [vmem:[%s2600_s14 + $0x4] sm:$0xf] }
 0x151   : > { %1162 = vmatpush.bf16.msrb.mxu1 %v2156_v36  ;;  %v1967_v36 = vld [vmem:[%s2600_s14 + $0x8] sm:$0xf0] }
 0x155   : > { %1163 = vmatpush.bf16.msrb.mxu1 %v2155_v37  ;;  %v1966_v37 = vor.u32 %v2162_v33, %v1965_v32 }
 0x159   : > { %1164 = vmatpush.bf16.msrb.mxu1 %v2154_v38  ;;  %v1970_v38 = vor.u32 %v2161_v35, %v1967_v36 }
 0x1c5   : > { %v924_v40 = vpop.f32.mrf.mxu0  ;;  %v937_v41 = vpop.f32.mrf.mxu1 }
 0x1c6   : > { %v958_v42 = vpack.c.bf16 %v937_v41, %v937_v41  ;;  %v957_v20 = vpack.c.bf16 %v924_v40, %v924_v40  ;;  %v2153_v41 = vld [vmem:[%s2585_s23] sm:$0xff] }
 0x1c7   : > { %1165 = vmatpush.bf16.msrb.mxu1 %v2153_v41 }
 0x1c8   : > { %v965_v43 = vsel %vm960_vm4, %v958_v42, 0  ;;  %v1023_v44 = vunpack.c.l.b16 %v958_v42  ;;  %v1018_v50 = vunpack.c.l.b16 %v957_v20 }
 0x1c9   : > { %974 = vmatpush.bf16.xpose.msra.mxu3 %v965_v43 }
 0x1ca   : > { %v1024_v45 = vpack.c.b16 %v1023_v44, %v1023_v44  ;;  %v1019_v52 = vpack.c.b16 %v1018_v50, %v1018_v50  ;;  %v2176_v50 = vld [vmem:[%s2600_s14 + $0x74] sm:$0xf0] }
 0x1cc   : > { %v950_v46 = vpop.f32.mrf.mxu2  ;;  %1025 = vrot.lane.b32.xlu2 %v1024_v45, %s2398_s24 }
 0x1cd   : > { %v959_v47 = vpack.c.bf16 %v950_v46, %v950_v46  ;;  %v926_v48 = vpop.f32.mrf.mxu0  ;;  %v939_v49 = vpop.f32.mrf.mxu1 }
 0x1ce   : > { %v2021_v49 = vld [vmem:[%s2600_s14 + $0x70] sm:$0xf] }
 0x1cf   : > { %v1002_v51 = vsel %vm1000_vm5, %v959_v47, 0  ;;  %v1061_v54 = vunpack.c.l.b16 %v959_v47 }
 0x1d0   : > { %1927 = vmatmul.msk.bf16.vlgmr.msra.gmra.mxu3 %vm960_vm4, %v957_v20  ;;  %v2277_v20 = vld [vmem:[%s2942_s29] ss:$0 sm:$0xff] }
 0x1d1   : > { %1011 = vmatpush.bf16.msrb.mxu3 %v1002_v51  ;;  %v1062_v55 = vpack.c.b16 %v1061_v54, %v1061_v54  ;;  %v2175_v51 = vld [vmem:[%s2600_s14 + $0x74] sm:$0xf] }
 0x1d4   : > { %v952_v53 = vpop.f32.mrf.mxu2  ;;  %1020 = vrot.lane.b32.xlu2 %v1019_v52, %s2398_s24  ;;  %v2022_v52 = vor.u32 %v2176_v50, %v2021_v49  ;;  %v2278_v50 = vld [vmem:[%s2943_s16] ss:$0 sm:$0xff] }
 0x1d5   : > { %v2023_v53 = vld [vmem:[%s2600_s14 + $0x78] sm:$0xf0] }
 0x1d6   : > { %v2026_v54 = vor.u32 %v2175_v51, %v2023_v53  ;;  %1305 = vmatpush.bf16.msrb.mxu2 %v2022_v52  ;;  %v2279_v53 = vld [vmem:[%s2944_s30] ss:$0 sm:$0xff] }
 0x1dc   : > { %1063 = vrot.lane.b32.xlu2 %v1062_v55, %s2398_s24 }
 0x226   : > { %v1026_v56 = vpop.permute.xlu2 %1025 }
 0x227   : > { %v1031_v57 = vsel %vm960_vm4, %v1026_v56, 0 }
 0x228   : > { %1040 = vmatpush.bf16.xpose.msra.mxu3 %v1031_v57 }
 0x22e   : > { %v1021_v58 = vpop.permute.xlu2 %1020 }
 0x236   : > { %v1064_v59 = vpop.permute.xlu2 %1063 }
 0x237   : > { %v1069_v60 = vsel %vm1000_vm5, %v1064_v59, 0  ;;  %v2174_v59 = vld [vmem:[%s2600_s14 + $0x64] sm:$0xf0] }
 0x238   : > { %1078 = vmatpush.bf16.msrb.mxu0 %v1069_v60  ;;  %v2173_v60 = vld [vmem:[%s2600_s14 + $0x64] sm:$0xf] }
 0x253   : > { %v976_v63 = vpop.f32.mrf.mxu3 }
 0x254   : > { %v980_v0 = vmul.f32 0.125, %v976_v63  ;;  %v2018_v63 = vor.u32 %v2173_v60, %v2015_v62  ;;  %v2181_v60 = vld [vmem:[%s2610_s0 + $0x20] sm:$0xff]  ;;  %v2180_v62 = vld [vmem:[%s2610_s0 + $0x18] sm:$0xff] }
 0x256   : > { %v983_v2 = vsel %vm956_vm6, %v980_v0, -inf  ;;  %v2005_v0 = vld [vmem:[%s2600_s14 + $0x50] sm:$0xf] }
 0x257   : > { %v985_v3 = vsel %vm984_vm7, %v983_v2, -inf }
 0x258   : > { %986 = vmax.xlane.f32.xlu1 %v985_v3  ;;  %v2171_v3 = vld [vmem:[%s2600_s14 + $0x54] sm:$0xf] }
 0x25b   : > { %v978_v4 = vpop.f32.mrf.mxu3 }
 0x2cb   : > { %v987_v5 = vpop.xlane.xlu1 %986 }
 0x2cc   : > { %v988_v6 = vsub.f32 %v983_v2, %v987_v5  ;;  %v2172_v2 = vld [vmem:[%s2600_s14 + $0x54] sm:$0xf0]  ;;  %v2007_v5 = vld [vmem:[%s2600_s14 + $0x58] sm:$0xf0] }
 0x2cd   : > { %v2006_v4 = vor.u32 %v2172_v2, %v2005_v0  ;;  %v2179_v0 = vld [vmem:[%s2610_s0 + $0x10] sm:$0xff] }
 0x2ce   : > { %v989_v7 = vmul.f32 1.442695, %v988_v6  ;;  %v2010_v6 = vor.u32 %v2171_v3, %v2007_v5  ;;  %v2187_v2 = vld [vmem:[%s2610_s0 + $0x50] sm:$0xff]  ;;  %v2178_v3 = vld [vmem:[%s2610_s0 + $0x8] sm:$0xff]  ;;  %v2177_v5 = vld [vmem:[%s2610_s0] sm:$0xff] }
 0x2d0   : > { %2285 = vpow2.f32 %v989_v7  ;;  %v1997_v7 = vld [vmem:[%s2600_s14 + $0x40] sm:$0xf] }
 0x2d6   : > { %v2286_v8 = vpop.eup %2285 }
 0x2d7   : > { %v991_v9 = vsel %vm984_vm7, %v2286_v8, 0.0 }
 0x2d8   : > { %992 = vadd.xlane.f32.xlu1 %v991_v9  ;;  %v2169_v9 = vld [vmem:[%s2600_s14 + $0x44] sm:$0xf] }
 0x34b   : > { %v993_v10 = vpop.xlane.xlu1 %992 }
 0x34c   : > { %2287 = vrcp.f32 %v993_v10 }
 0x352   : > { %v2288_v11 = vpop.eup %2287 }
 0x353   : > { %v995_v12 = vmul.f32 %v2288_v11, %v2286_v8  ;;  %v2170_v8 = vld [vmem:[%s2600_s14 + $0x44] sm:$0xf0]  ;;  %v1999_v11 = vld [vmem:[%s2600_s14 + $0x48] sm:$0xf0] }
 0x354   : > { %v1998_v10 = vor.u32 %v2170_v8, %v1997_v7  ;;  %v1219_v7 = vld [vmem:[%s2605_s15] sm:$0x3] }
 0x355   : > { %v996_v13 = vpack.c.bf16 %v995_v12, %v995_v12  ;;  %v2002_v12 = vor.u32 %v2169_v9, %v1999_v11  ;;  %v1221_v8 = vperm.slane %v1219_v7, 0  ;;  %v1222_v9 = vperm.slane %v1219_v7, 1 }
 0x357   : > { %1928 = vmatmul.msk.bf16.vlgmr.msrb.gmra.mxu3 %vm984_vm7, %v996_v13  ;;  %v1989_v13 = vld [vmem:[%s2600_s14 + $0x30] sm:$0xf] }
 0x358   : > { %1318 = vmatpush.bf16.msrb.mxu3 %v2026_v54 }
 0x35c   : > { %1319 = vmatpush.bf16.msrb.mxu3 %v2018_v63  ;;  %v2188_v63 = vld [vmem:[%s2610_s0 + $0x58] sm:$0xff] }
 0x360   : > { %1320 = vmatpush.bf16.msrb.mxu3 %v2010_v6  ;;  %v2185_v6 = vld [vmem:[%s2610_s0 + $0x40] sm:$0xff] }
 0x364   : > { %1321 = vmatpush.bf16.msrb.mxu3 %v2002_v12 }
 0x367   : > { %1929 = vmatmul.msk.bf16.vlgmr.msra.gmra.mxu3 %vm960_vm4, %v1021_v58  ;;  %v2013_v58 = vld [vmem:[%s2600_s14 + $0x60] sm:$0xf] }
 0x368   : > { %v2014_v61 = vor.u32 %v2174_v59, %v2013_v58  ;;  %v2191_v58 = vld [vmem:[%s2610_s0 + $0x70] sm:$0xff]  ;;  %v2190_v59 = vld [vmem:[%s2610_s0 + $0x68] sm:$0xff] }
 0x36a   : > { %1306 = vmatpush.bf16.msrb.mxu2 %v2014_v61  ;;  %v2189_v61 = vld [vmem:[%s2610_s0 + $0x60] sm:$0xff] }
 0x36e   : > { %1307 = vmatpush.bf16.msrb.mxu2 %v2006_v4  ;;  %v2186_v4 = vld [vmem:[%s2610_s0 + $0x48] sm:$0xff] }
 0x372   : > { %1308 = vmatpush.bf16.msrb.mxu2 %v1998_v10 }
 0x3da   : > { %v1013_v14 = vpop.f32.mrf.mxu3 }
 0x3e2   : > { %v1015_v15 = vpop.f32.mrf.mxu3 }
 0x3e3   : > { %v2167_v15 = vld [vmem:[%s2600_s14 + $0x34] sm:$0xf] }
 0x3ea   : > { %v1042_v16 = vpop.f32.mrf.mxu3 }
 0x3eb   : > { %v1046_v18 = vmul.f32 0.125, %v1042_v16 }
 0x3ed   : > { %v1047_v19 = vsel %vm956_vm6, %v1046_v18, -inf  ;;  %v1991_v18 = vld [vmem:[%s2600_s14 + $0x38] sm:$0xf0] }
 0x3ee   : > { %v1048_v21 = vsel %vm984_vm7, %v1047_v19, -inf }
 0x3ef   : > { %1049 = vmax.xlane.f32.xlu0 %v1048_v21  ;;  %v1981_v21 = vld [vmem:[%s2600_s14 + $0x20] sm:$0xf] }
 0x3f2   : > { %v1044_v22 = vpop.f32.mrf.mxu3 }
 0x3f3   : > { %v2166_v22 = vld [vmem:[%s2600_s14 + $0x24] sm:$0xf0] }
 0x462   : > { %v1050_v23 = vpop.xlane.xlu0 %1049 }
 0x463   : > { %v1051_v24 = vsub.f32 %v1047_v19, %v1050_v23  ;;  %v1994_v19 = vor.u32 %v2167_v15, %v1991_v18  ;;  %v2165_v23 = vld [vmem:[%s2600_s14 + $0x24] sm:$0xf] }
 0x465   : > { %v1052_v25 = vmul.f32 1.442695, %v1051_v24  ;;  %1322 = vmatpush.bf16.msrb.mxu3 %v1994_v19  ;;  %v1982_v24 = vor.u32 %v2166_v22, %v1981_v21 }
 0x467   : > { %2289 = vpow2.f32 %v1052_v25  ;;  %v1983_v25 = vld [vmem:[%s2600_s14 + $0x28] sm:$0xf0] }
 0x46d   : > { %v2290_v26 = vpop.eup %2289 }
 0x46e   : > { %v1054_v27 = vsel %vm984_vm7, %v2290_v26, 0.0 }
 0x46f   : > { %1055 = vadd.xlane.f32.xlu1 %v1054_v27  ;;  %v1973_v27 = vld [vmem:[%s2600_s14 + $0x10] sm:$0xf] }
 0x4e2   : > { %v1056_v28 = vpop.xlane.xlu1 %1055 }
 0x4e3   : > { %2291 = vrcp.f32 %v1056_v28  ;;  %v2164_v28 = vld [vmem:[%s2600_s14 + $0x14] sm:$0xf0] }
 0x4e9   : > { %v2292_v29 = vpop.eup %2291 }
 0x4ea   : > { %v1058_v30 = vmul.f32 %v2292_v29, %v2290_v26  ;;  %v1986_v26 = vor.u32 %v2165_v23, %v1983_v25  ;;  %v2163_v29 = vld [vmem:[%s2600_s14 + $0x14] sm:$0xf] }
 0x4ec   : > { %v1059_v31 = vpack.c.bf16 %v1058_v30, %v1058_v30  ;;  %1323 = vmatpush.bf16.msrb.mxu3 %v1986_v26  ;;  %v1974_v30 = vor.u32 %v2164_v28, %v1973_v27 }
 0x4ee   : > { %1930 = vmatmul.msk.bf16.vlgmr.msrb.gmra.mxu0 %vm984_vm7, %v1059_v31  ;;  %v1975_v31 = vld [vmem:[%s2600_s14 + $0x18] sm:$0xf0] }
 0x4ef   : > { %v1978_v34 = vor.u32 %v2163_v29, %v1975_v31 }
 0x4f1   : > { %1324 = vmatpush.bf16.msrb.mxu3 %v1978_v34 }
 0x4f5   : > { %1325 = vmatpush.bf16.msrb.mxu3 %v1970_v38 }
 0x56b   : > { %v1080_v39 = vpop.f32.mrf.mxu0 }
 0x56c   : > { %1085 = vrot.lane.b32.xlu0 %v1080_v39, %s2398_s24  ;;  %v2184_v39 = vld [vmem:[%s2610_s0 + $0x38] sm:$0xff] }
 0x56d   : > { %1479 = vmatpush.bf16.msra.mxu0 %v2184_v39 }
 0x573   : > { %v1082_v40 = vpop.f32.mrf.mxu0 }
 0x574   : > { %v2192_v40 = vld [vmem:[%s2610_s0 + $0x78] sm:$0xff] }
 0x575   : > { %1492 = vmatpush.bf16.msra.mxu1 %v2192_v40 }
 0x579   : > { %1493 = vmatpush.bf16.msra.mxu1 %v2191_v58 }
 0x57d   : > { %1494 = vmatpush.bf16.msra.mxu1 %v2190_v59 }
 0x581   : > { %1495 = vmatpush.bf16.msra.mxu1 %v2189_v61 }
 0x585   : > { %1496 = vmatpush.bf16.msra.mxu1 %v2188_v63 }
 0x589   : > { %1497 = vmatpush.bf16.msra.mxu1 %v2187_v2 }
 0x58d   : > { %1498 = vmatpush.bf16.msra.mxu1 %v2186_v4 }
 0x591   : > { %1499 = vmatpush.bf16.msra.mxu1 %v2185_v6 }
 0x5de   : > { %v1086_v42 = vpop.permute.xlu0 %1085 }
 0x5df   : > { %v1088_v43 = vsel %vm960_vm4, %v1013_v14, %v1086_v42  ;;  %v2168_v14 = vld [vmem:[%s2600_s14 + $0x34] sm:$0xf0] }
 0x5e0   : > { %v1089_v44 = vpack.c.bf16 %v1088_v43, %v1088_v43  ;;  %v1990_v16 = vor.u32 %v2168_v14, %v1989_v13 }
 0x5e2   : > { %1166 = vmatmul.bf16.vlgmr.msrb.gmra.mxu1 %v1089_v44  ;;  %1309 = vmatpush.bf16.msrb.mxu2 %v1990_v16 }
 0x5e6   : > { %1310 = vmatpush.bf16.msrb.mxu2 %v1982_v24 }
 0x5ea   : > { %1311 = vmatpush.bf16.msrb.mxu2 %v1974_v30 }
 0x5ee   : > { %1312 = vmatpush.bf16.msrb.mxu2 %v1966_v37 }
 0x65f   : > { %v1167_v45 = vpop.f32.mrf.mxu1 }
 0x660   : > { %v1168_v46 = vadd.f32 %v2277_v20, %v1167_v45 }
 0x662   : > { %v2725_v47 = vadd.f32 %v1168_v46, %v2621_v1 }
 0x664   : > { %1174 = vadd.xlane.f32.xlu1 %v2725_v47 }
 0x667   : > { %v1169_v48 = vpop.f32.mrf.mxu1 }
 0x6d7   : > { %v1175_v1 = vpop.xlane.xlu1 %1174 }
 0x6d8   : > { %v1176_v55 = vmul.f32 %v1175_v1, %v2630_v17 }
 0x6da   : > { %v2734_v56 = vsub.f32 %v2725_v47, %v1176_v55 }
 0x6dc   : > { %v1178_v57 = vmul.f32 %v2734_v56, %v2734_v56 }
 0x6de   : > { %1179 = vadd.xlane.f32.xlu2 %v1178_v57  ;;  %v2183_v57 = vld [vmem:[%s2610_s0 + $0x30] sm:$0xff] }
 0x6df   : > { %1480 = vmatpush.bf16.msra.mxu0 %v2183_v57 }
 0x751   : > { %v1180_v41 = vpop.xlane.xlu2 %1179 }
 0x752   : > { %v1181_v42 = vmul.f32 %v1180_v41, %v2630_v17  ;;  %v2280_v41 = vld [vmem:[%s708_s18] ss:$0 sm:$0xff]  ;;  %s2948_s18 = sld [smem:[#allocation21_spill]] (!%p2091_p1) }
 0x754   : > { %v1182_v43 = vadd.f32 1e-05, %v1181_v42 }
 0x756   : > { %2293 = vrsqrt.f32 %v1182_v43  ;;  %vm1189_vm9 = vweird.f32 %v1182_v43 }
 0x75c   : > { %v2294_v44 = vpop.eup %2293 }
 0x75d   : > { %v1184_v20 = vmul.f32 %v2294_v44, %v1182_v43  ;;  %vm1190_vm8 = vweird.f32 %v2294_v44 }
 0x75e   : > { %vm1191_vm10 = vmor %vm1189_vm9, %vm1190_vm8 }
 0x75f   : > { %v1185_v45 = vmul.f32 %v2294_v44, %v1184_v20 }
 0x761   : > { %v1186_v46 = vmul.f32 0.5, %v1185_v45 }
 0x763   : > { %v1187_v48 = vsub.f32 1.5, %v1186_v46 }
 0x765   : > { %v1188_v49 = vmul.f32 %v2294_v44, %v1187_v48 }
 0x767   : > { %v1192_v51 = vsel %vm1191_vm10, %v2294_v44, %v1188_v49 }
 0x768   : > { %v1193_v52 = vmul.f32 %v1192_v51, %v2734_v56  ;;  %v2182_v56 = vld [vmem:[%s2610_s0 + $0x28] sm:$0xff] }
 0x769   : > { %1481 = vmatpush.bf16.msra.mxu0 %v2182_v56 }
 0x76a   : > { %v1197_v54 = vmul.f32 %v2278_v50, %v1193_v52 }
 0x76c   : > { %v1201_v1 = vadd.f32 %v2279_v53, %v1197_v54 }
 0x76d   : > { %1482 = vmatpush.bf16.msra.mxu0 %v2181_v60 }
 0x76e   : > { %v1202_v55 = vpack.c.bf16 %v1201_v1, %v1201_v1 }
 0x770   : > { %1313 = vmatmul.bf16.vlgmr.msrb.gmra.mxu2 %v1202_v55  ;;  %1326 = vmatmul.bf16.vlgmr.msrb.gmra.mxu3 %v1202_v55 }
 0x771   : > { %1483 = vmatpush.bf16.msra.mxu0 %v2180_v62 }
 0x775   : > { %1484 = vmatpush.bf16.msra.mxu0 %v2179_v0 }
 0x779   : > { %1485 = vmatpush.bf16.msra.mxu0 %v2178_v3 }
 0x77d   : > { %1486 = vmatpush.bf16.msra.mxu0 %v2177_v5 }
 0x7f3   : > { %v1314_v10 = vpop.f32.mrf.mxu2  ;;  %v1327_v11 = vpop.f32.mrf.mxu3 }
 0x7f4   : > { %v1315_v12 = vadd.f32 %v1314_v10, %v1221_v8  ;;  %v1328_v13 = vadd.f32 %v1327_v11, %v1222_v9 }
 0x7f6   : > { %v1331_v14 = vmul.f32 %v1315_v12, %v1315_v12  ;;  %v1332_v15 = vmul.f32 %v1328_v13, %v1328_v13 }
 0x7f8   : > { %v1333_v16 = vmul.f32 %v1331_v14, %v1315_v12  ;;  %v1334_v18 = vmul.f32 %v1332_v15, %v1328_v13 }
 0x7fa   : > { %v1335_v19 = vmul.f32 0.044715, %v1333_v16  ;;  %v1336_v21 = vmul.f32 0.044715, %v1334_v18 }
 0x7fb   : > { %v1316_v22 = vpop.f32.mrf.mxu2  ;;  %v1329_v23 = vpop.f32.mrf.mxu3 }
 0x7fc   : > { %v1337_v24 = vadd.f32 %v1335_v19, %v1315_v12  ;;  %v1338_v25 = vadd.f32 %v1336_v21, %v1328_v13 }
 0x7fe   : > { %v1339_v26 = vmul.f32 0.7978846, %v1337_v24  ;;  %v1340_v27 = vmul.f32 0.7978846, %v1338_v25 }
 0x800   : > { %2295 = vtanh.f32 %v1339_v26 }
 0x801   : > { %2297 = vtanh.f32 %v1340_v27 }
 0x806   : > { %v2296_v28 = vpop.eup %2295 }
 0x807   : > { %v2298_v29 = vpop.eup %2297  ;;  %v1343_v30 = vadd.f32 1.0, %v2296_v28 }
 0x808   : > { %v1344_v31 = vadd.f32 1.0, %v2298_v29 }
 0x809   : > { %v1345_v32 = vmul.f32 0.5, %v1343_v30 }
 0x80a   : > { %v1346_v33 = vmul.f32 0.5, %v1344_v31 }
 0x80b   : > { %v1347_v34 = vmul.f32 %v1345_v32, %v1315_v12 }
 0x80c   : > { %v1348_v35 = vmul.f32 %v1346_v33, %v1328_v13 }
 0x80d   : > { %v1349_v36 = vpack.c.bf16 %v1347_v34, %v1347_v34 }
 0x80e   : > { %v1350_v37 = vpack.c.bf16 %v1348_v35, %v1348_v35 }
 0x80f   : > { %1487 = vmatmul.bf16.vlgmr.msra.gmra.mxu0 %v1349_v36 }
 0x810   : > { %1500 = vmatmul.bf16.vlgmr.msra.gmra.mxu1 %v1350_v37 }
 0x88c   : > { %v1488_v38 = vpop.f32.mrf.mxu0 }
 0x88d   : > { %v1501_v39 = vpop.f32.mrf.mxu1 }
 0x88e   : > { %v1502_v40 = vadd.f32 %v1501_v39, %v1488_v38 }
 0x890   : > { %v1505_v42 = vadd.f32 %v1502_v40, %v2725_v47 }
 0x891   : > { %1515 = sbr.rel (%p2091_p1) target bundleno = 2603 (0xa2b), region = 92 }
 0x892   : > { %v1510_v43 = vadd.f32 %v2280_v41, %v1505_v42 }
 0x894   : > { %1511 = vst [vmem:[#allocation2] sm:$0xff] %v1510_v43  ;;  %v1490_v44 = vpop.f32.mrf.mxu0 }
 0x895   : > { %v1503_v20 = vpop.f32.mrf.mxu1 }
 0x896   : > { %vm1518_vm11 = vcmask 1040384   ;;  %v2200_v46 = vld [vmem:[%s2946_s13 + $0x38] sm:$0xff]  ;;  %v2199_v52 = vld [vmem:[%s2946_s13 + $0x30] sm:$0xff]  ;;  %v2198_v53 = vld [vmem:[%s2946_s13 + $0x28] sm:$0xff] }
 0x897   : > { %v1519_v45 = vsel %vm1518_vm11, %v1510_v43, 0.0  ;;  %1609 = vmatpush.bf16.msra.mxu0 %v2200_v46  ;;  %v2197_v54 = vld [vmem:[%s2946_s13 + $0x20] sm:$0xff]  ;;  %v2196_v1 = vld [vmem:[%s2946_s13 + $0x18] sm:$0xff]  ;;  %v2195_v55 = vld [vmem:[%s2946_s13 + $0x10] sm:$0xff] }
 0x898   : > { %1520 = vadd.xlane.f32.xlu0 %v1519_v45  ;;  %v2194_v57 = vld [vmem:[%s2946_s13 + $0x8] sm:$0xff]  ;;  %v2193_v58 = vld [vmem:[%s2946_s13] sm:$0xff] }
 0x899   : > { %v1516_v4 = vld [vmem:[%s2947_s17] sm:$0x1] }
 0x89a   : > { %v1560_v10 = vld [vmem:[%s2949_s27] sm:$0x1] }
 0x89b   : > { %1610 = vmatpush.bf16.msra.mxu0 %v2199_v52 }
 0x89f   : > { %1611 = vmatpush.bf16.msra.mxu0 %v2198_v53 }
 0x8a3   : > { %1612 = vmatpush.bf16.msra.mxu0 %v2197_v54 }
 0x8a7   : > { %1613 = vmatpush.bf16.msra.mxu0 %v2196_v1 }
 0x8ab   : > { %1614 = vmatpush.bf16.msra.mxu0 %v2195_v55 }
 0x8af   : > { %1615 = vmatpush.bf16.msra.mxu0 %v2194_v57 }
 0x8b3   : > { %1616 = vmatpush.bf16.msra.mxu0 %v2193_v58 }
 0x90b   : > { %v1521_v48 = vpop.xlane.xlu0 %1520 }
 0x90c   : > { %v1522_v49 = vmul.f32 %v1521_v48, %v2630_v17 }
 0x90e   : > { %v1523_v50 = vsub.f32 %v1510_v43, %v1522_v49 }
 0x910   : > { %v1524_v47 = vmul.f32 %v1523_v50, %v1523_v50 }
 0x912   : > { %v1525_v51 = vsel %vm1518_vm11, %v1524_v47, 0.0 }
 0x913   : > { %1526 = vadd.xlane.f32.xlu0 %v1525_v51 }
 0x986   : > { %v1527_v56 = vpop.xlane.xlu0 %1526 }
 0x987   : > { %v1528_v59 = vmul.f32 %v1527_v56, %v2630_v17  ;;  %v1517_v17 = vld [vmem:[%s2948_s18] sm:$0x1] }
 0x989   : > { %v1529_v60 = vadd.f32 1e-05, %v1528_v59 }
 0x98b   : > { %2299 = vrsqrt.f32 %v1529_v60  ;;  %vm1536_vm13 = vweird.f32 %v1529_v60 }
 0x991   : > { %v2300_v61 = vpop.eup %2299 }
 0x992   : > { %v1531_v62 = vmul.f32 %v2300_v61, %v1529_v60  ;;  %vm1537_vm12 = vweird.f32 %v2300_v61 }
 0x993   : > { %vm1538_vm14 = vmor %vm1536_vm13, %vm1537_vm12 }
 0x994   : > { %v1532_v63 = vmul.f32 %v2300_v61, %v1531_v62 }
 0x996   : > { %v1533_v0 = vmul.f32 0.5, %v1532_v63 }
 0x998   : > { %v1534_v2 = vsub.f32 1.5, %v1533_v0 }
 0x99a   : > { %v1535_v3 = vmul.f32 %v2300_v61, %v1534_v2 }
 0x99c   : > { %v1539_v5 = vsel %vm1538_vm14, %v2300_v61, %v1535_v3 }
 0x99d   : > { %v1540_v6 = vmul.f32 %v1539_v5, %v1523_v50 }
 0x99f   : > { %v1541_v7 = vmul.f32 %v1540_v6, %v1516_v4 }
 0x9a1   : > { %v1542_v8 = vadd.f32 %v1541_v7, %v1517_v17 }
 0x9a3   : > { %v1543_v9 = vpack.c.bf16 %v1542_v8, %v1542_v8 }
 0x9a5   : > { %1617 = vmatmul.bf16.vlgmr.msra.gmra.mxu0 %v1543_v9 }
 0xa22   : > { %v1618_v11 = vpop.f32.mrf.mxu0 }
 0xa23   : > { %v1619_v12 = vadd.f32 %v1618_v11, %v1560_v10 }
 0xa25   : > { %1622 = vst [vmem:[%s2618_s28] sm:$0x1] %v1619_v12 }
 0xa2a   : > { %v1620_v13 = vpop.f32.mrf.mxu0 }
 0xa2b PF: > { %s2950_s20 = sld [smem:[#allocation9_spill]]  ;;  %s1634_s19 = sshll.u32 %s2618_s28, 4  ;;  %s1635_s19 = int_to_ptr.vmem [resolvable:$true] %s1634_s19 }
 0xa2c   : > { %s2951_s14 = sld [smem:[#allocation24_spill]]  ;;  %s2953_s15 = sand.u32 1, %s2371_s22  }
 0xa2d   : > { %s1624_s0 = scalar_lea.sflag [#allocation4], %s2953_s15 }
 0xa32   : > { %s1632_s5 = scalar_lea.hbm %s2951_s14, %s2950_s20  ;;  %s2321_s18 = scalar_lea.hbm %s2951_s14, 2 }
 0xa33   : > { %s1636_s30 = sshll.u32 %s1632_s5, 4  ;;  %s1637_s30 = int_to_ptr.hbm [resolvable:$true] %s1636_s30 }
 0xa34   : > { %s2315_s26 = sshra.s32 %s1637_s30, 4  ;;  %s2316_s26 = int_to_ptr.hbm [resolvable:$true] %s2315_s26 }
 0xa35   : > { %s2317_s17 = scalar_lea.hbm %s2316_s26, 1  ;;  %p2322_p6 = scmp.lt.s32.totalorder %s2316_s26, %s2951_s14 }
 0xa36   : > { %p2318_p2 = scmp.ne.s32.totalorder %s2316_s26, %s2317_s17  ;;  %p2323_p7 = scmp.lt.s32.totalorder %s2321_s18, %s2317_s17 }
 0xa38   : > { %p2319_p4 = pnand %p2318_p2, %p2533_p3  ;;  %p2324_p8 = por %p2323_p7, %p2322_p6 }
 0xa3a   : > { %p2320_p5 = pneg %p2319_p4 }
 0xa3c   : > { %p2325_p10 = pnand %p2324_p8, %p2320_p5 }
 0xa3e   : > { %2328 = shalt.err (!%p2325_p10)
}
 0xa3f   : > { %2202 = dma.vmem_to_hbm [thread:$0]  (%p2533_p3), %s1635_s19, 16, %s1637_s30, %s1624_s0  }
 0xa40 PF: > { %s2954_s28 = sld [smem:[#allocation12_spill]] }
 0xa41   : > { %s2955_s27 = sld [smem:[#allocation6_spill]] }
 0xa46   : > { %p2208_p11 = scmp.ge.s32.totalorder %s2954_s28, 2 }
 0xa47   : > { %s1648_s29 = sand.u32 1, %s2955_s27  }
 0xa48   : > { %p2205_p12 = pnand %p2208_p11, %p2543_p9  ;;  %s1649_s23 = scalar_lea.sflag [#allocation4], %s1648_s29 }
 0xa4a   : > { %p2206_p13 = pneg %p2205_p12 }
 0xa4c   : > { %2362 = dma.done.wait (%p2206_p13), %s1649_s23, 16  }
 0xa4d   : > { %2364 = vsyncadd (%p2206_p13), %s1649_s23, 4294967280  ;;  %s29_s28 = sadd.s32 1, %s2954_s28   ;;  %s2957_s5 = sld [smem:[#allocation7_spill]] }
 0xa4e   : > { %p26_p0 = scmp.ge.s32.totalorder %s29_s28, 6   ;;  %s2958_s23 = sld [smem:[#allocation17_spill]] }
 0xa4f   : > { %s2959_s24 = sld [smem:[#allocation10_spill]]  ;;  %s2963_s21 = smov %s2371_s22 }
 0xa50   : > { %s2960_s25 = sld [smem:[#allocation11_spill]]  ;;  %28 = sbr.rel (!%p26_p0) target bundleno = 13 (0xd), region = 160 }
 0xa51   : > { %s2961_s26 = sld [smem:[#allocation13_spill]] }
 0xa52   : > { %s2962_s27 = sld [smem:[#allocation15_spill]] }
 0xa53   : > { %s2964_s22 = smov %s2957_s5 }
 0xa55   :  { %1654 = vsyncpa [#allocation4], 1 }
 0xa56   :  { %1656 = vsyncpa [#allocation4 + $0x1], 1 }

</bundles_post_ra>
